<compile_context>
chip_gen: v6e
topology: v6e:2x2x1
jax: 0.10.0
libtpu: 0.0.40
codegen_flags: <defaults>
</compile_context>

<pallas_src>
import jax
import jax.numpy as jnp
from jax import lax
from jax.experimental import pallas as pl
from jax.experimental.pallas import tpu as pltpu

N = 2              # batch
H, W = 8, 90       # input spatial dims implied by the module (view(-1, 50*6))
C1, C2 = 10, 50    # conv channels
KW, WOUT = 15, 6   # conv2 kernel width / output width (W == KW * WOUT)
FC1, FC2 = 100, 2


def _sigmoid(x):
    # exp on EUP + approximate reciprocal on EUP (avoids the VALU divide).
    return pl.reciprocal(1.0 + jnp.exp(-x), approx=True)


# ------------------------- fused Pallas kernel -------------------------

def net_kernel(x_ref, w1_ref, b1_ref, w2_ref, b2_ref,
               wf1_ref, bf1_ref, wf2_ref, bf2_ref,
               o_ref, a1_ref, s_ref):
    # ---- conv1 (kernel (8,1)) + scaled tanh: one (90,8)@(8,10) dot per batch ----
    for n in range(N):
        xn = jnp.transpose(x_ref[n, 0])                              # (90, 8)
        y = jnp.dot(xn, w1_ref[...],
                    preferred_element_type=jnp.float32) + b1_ref[...]  # (90, 10)
        a1_ref[n * W:(n + 1) * W, :] = 1.7159 * jnp.tanh((2.0 / 3.0) * y)

    # ---- conv2 (kernel (1,15), stride 15): 15 accumulated dots over ----
    # ---- sublane-strided slices of a1 (rows ordered r = n*6 + wb).   ----
    acc = jnp.zeros((N * WOUT, C2), jnp.float32)
    for kw in range(KW):
        rows = a1_ref[pl.ds(kw, N * WOUT, stride=KW), :]             # (12, 10)
        acc = acc + jnp.dot(rows, w2_ref[kw],
                            preferred_element_type=jnp.float32)      # (12, 50)
    s_ref[...] = _sigmoid(acc + b2_ref[...])                         # (12, 50)

    # ---- fc1 over the NCHW flatten (j = o*6 + wb) without materializing it ----
    h = bf1_ref[...]                                                 # (1, 100)
    for wb in range(WOUT):
        rows = s_ref[pl.ds(wb, N, stride=WOUT), :]                   # (2, 50)
        h = h + jnp.dot(rows, wf1_ref[wb],
                        preferred_element_type=jnp.float32)          # (2, 100)
    h = _sigmoid(h)

    # ---- fc2 + final sigmoid ----
    o_ref[...] = _sigmoid(jnp.dot(h, wf2_ref[...],
                                  preferred_element_type=jnp.float32)
                          + bf2_ref[...])                            # (2, 2)


# ------------------------- weight pre-formatting (one-time) -------------------------

def prepare_params(params):
    """Hoisted out of the per-step path: matmul-ready weights + bias rows."""
    W1, b1, W2, b2, Wf1, bf1, Wf2, bf2 = params
    w1m = jnp.transpose(W1[:, 0, :, 0])                              # (8, 10)
    w2k = jnp.transpose(W2[:, :, 0, :], (2, 1, 0))                   # (15, 10, 50)
    # wf1k[wb, o, f] = Wf1[f, o*6 + wb]  (matches torch's NCHW flatten order)
    wf1k = jnp.transpose(Wf1).reshape(C2, WOUT, FC1).transpose(1, 0, 2)  # (6, 50, 100)
    wf2t = jnp.transpose(Wf2)                                        # (100, 2)
    return (w1m, b1.reshape(1, C1), w2k, b2.reshape(1, C2),
            wf1k, bf1.reshape(1, FC1), wf2t, bf2.reshape(1, FC2))


# ------------------------- forward pass -------------------------

@jax.jit
def net_nonsquare_forward(x, prepped):
    """x: (N, 1, 8, 90) float32 NCHW; prepped: output of prepare_params()."""
    w1m, b1r, w2k, b2r, wf1k, bf1r, wf2t, bf2r = prepped
    vmem = pl.BlockSpec(memory_space=pltpu.MemorySpace.VMEM)
    return pl.pallas_call(
        net_kernel,
        out_shape=jax.ShapeDtypeStruct((N, FC2), jnp.float32),
        in_specs=[vmem] * 9,
        out_specs=vmem,
        scratch_shapes=[pltpu.VMEM((N * W, C1), jnp.float32),   # conv1 activations
                        pltpu.VMEM((N * WOUT, C2), jnp.float32)],  # sigmoid(conv2)
        cost_estimate=pl.CostEstimate(flops=340_000, transcendentals=2_700,
                                      bytes_accessed=170_000),
    )(x, w1m, b1r, w2k, b2r, wf1k, bf1r, wf2t, bf2r)


# ------------------------- pure-JAX reference -------------------------

def reference_forward(x, params):
    W1, b1, W2, b2, Wf1, bf1, Wf2, bf2 = params
    dn = ("NCHW", "OIHW", "NCHW")
    y = lax.conv_general_dilated(x, W1, (1, 1), "VALID", dimension_numbers=dn)
    y = y + b1.reshape(1, -1, 1, 1)
    y = 1.7159 * jnp.tanh((2.0 / 3.0) * y)
    y = lax.conv_general_dilated(y, W2, (15, 15), "VALID", dimension_numbers=dn)
    y = y + b2.reshape(1, -1, 1, 1)
    y = y.reshape(-1, C2 * WOUT)
    y = jax.nn.sigmoid(y) @ Wf1.T + bf1
    y = jax.nn.sigmoid(y) @ Wf2.T + bf2
    return jax.nn.sigmoid(y)


# ------------------------- parameter init -------------------------

def init_params(key):
    ks = jax.random.split(key, 8)

    def u(k, shape, fan_in):
        bound = 1.0 / jnp.sqrt(jnp.float32(fan_in))
        return jax.random.uniform(k, shape, jnp.float32, -bound, bound)

    W1 = u(ks[0], (C1, 1, 8, 1), 1 * 8 * 1)        # conv1.weight
    b1 = u(ks[1], (C1,), 1 * 8 * 1)                # conv1.bias
    W2 = u(ks[2], (C2, C1, 1, 15), C1 * 1 * 15)    # conv2.weight
    b2 = u(ks[3], (C2,), C1 * 1 * 15)              # conv2.bias
    Wf1 = u(ks[4], (FC1, C2 * WOUT), C2 * WOUT)    # fc1.weight
    bf1 = u(ks[5], (FC1,), C2 * WOUT)              # fc1.bias
    Wf2 = u(ks[6], (FC2, FC1), FC1)                # fc2.weight
    bf2 = u(ks[7], (FC2,), FC1)                    # fc2.bias
    return (W1, b1, W2, b2, Wf1, bf1, Wf2, bf2)


if __name__ == "__main__":
    key = jax.random.PRNGKey(0)
    kx, kp = jax.random.split(key)
    x = jax.random.normal(kx, (N, 1, H, W), jnp.float32)
    params = init_params(kp)
    prepped = prepare_params(params)   # one-time weight formatting, outside forward

    out = jax.block_until_ready(net_nonsquare_forward(x, prepped))
    ref = jax.block_until_ready(reference_forward(x, params))

    assert out.shape == (N, FC2), out.shape
    # slightly looser tolerance because sigmoid uses the EUP approx reciprocal
    assert jnp.allclose(out, ref, atol=5e-3, rtol=5e-3), (out, ref)
    print("KERNEL_OK")
</pallas_src>

<mosaic_0001>
module attributes {stable_mosaic.version = 11 : i64} {
  func.func @net_kernel(%arg0: memref<2x1x8x90xf32, #tpu.memory_space<vmem>>, %arg1: memref<8x10xf32, #tpu.memory_space<vmem>>, %arg2: memref<1x10xf32, #tpu.memory_space<vmem>>, %arg3: memref<15x10x50xf32, #tpu.memory_space<vmem>>, %arg4: memref<1x50xf32, #tpu.memory_space<vmem>>, %arg5: memref<6x50x100xf32, #tpu.memory_space<vmem>>, %arg6: memref<1x100xf32, #tpu.memory_space<vmem>>, %arg7: memref<100x2xf32, #tpu.memory_space<vmem>>, %arg8: memref<1x2xf32, #tpu.memory_space<vmem>>, %arg9: memref<2x2xf32, #tpu.memory_space<vmem>>, %arg10: memref<180x10xf32, #tpu.memory_space<vmem>>, %arg11: memref<12x50xf32, #tpu.memory_space<vmem>>) attributes {dimension_semantics = [], scalar_prefetch = 0 : i64, scratch_operands = 2 : i64, tpu.core_type = #tpu.core_type<tc>} {
    %c0 = arith.constant 0 : index
    %c0_0 = arith.constant 0 : index
    %c0_1 = arith.constant 0 : index
    %c0_2 = arith.constant 0 : index
    %0 = vector.load %arg0[%c0, %c0_0, %c0_1, %c0_2] : memref<2x1x8x90xf32, #tpu.memory_space<vmem>>, vector<1x1x8x90xf32>
    %1 = vector.shape_cast %0 : vector<1x1x8x90xf32> to vector<8x90xf32>
    %2 = tpu.transpose %1, [1, 0] : vector<8x90xf32> -> vector<90x8xf32>
    %c0_3 = arith.constant 0 : index
    %c0_4 = arith.constant 0 : index
    %3 = vector.load %arg1[%c0_3, %c0_4] : memref<8x10xf32, #tpu.memory_space<vmem>>, vector<8x10xf32>
    %cst = arith.constant dense<0.000000e+00> : vector<90x10xf32>
    %4 = tpu.matmul %2, %3, %cst {dimension_numbers = #tpu.dot_dimension_numbers<[1], [0], [0], [1], [0, 0, 1, 1], [], []>} : vector<90x8xf32>, vector<8x10xf32>, vector<90x10xf32> -> vector<90x10xf32>
    %c0_5 = arith.constant 0 : index
    %c0_6 = arith.constant 0 : index
    %5 = vector.load %arg2[%c0_5, %c0_6] : memref<1x10xf32, #tpu.memory_space<vmem>>, vector<1x10xf32>
    %6 = vector.broadcast %5 : vector<1x10xf32> to vector<90x10xf32>
    %7 = arith.addf %4, %6 : vector<90x10xf32>
    %cst_7 = arith.constant 0.666666686 : f32
    %8 = vector.broadcast %cst_7 : f32 to vector<90x10xf32>
    %9 = arith.mulf %8, %7 : vector<90x10xf32>
    %10 = math.tanh %9 : vector<90x10xf32>
    %cst_8 = arith.constant 1.715900e+00 : f32
    %11 = vector.broadcast %cst_8 : f32 to vector<90x10xf32>
    %12 = arith.mulf %11, %10 : vector<90x10xf32>
    %c0_9 = arith.constant 0 : index
    %c0_10 = arith.constant 0 : index
    %13 = vector.load %arg10[%c0_9, %c0_10] : memref<180x10xf32, #tpu.memory_space<vmem>>, vector<90x10xf32>
    tpu.vector_store %arg10[%c0_9, %c0_10], %12 {strides = array<i32>} : memref<180x10xf32, #tpu.memory_space<vmem>>, vector<90x10xf32>,
    %c1 = arith.constant 1 : index
    %c0_11 = arith.constant 0 : index
    %c0_12 = arith.constant 0 : index
    %c0_13 = arith.constant 0 : index
    %14 = vector.load %arg0[%c1, %c0_11, %c0_12, %c0_13] : memref<2x1x8x90xf32, #tpu.memory_space<vmem>>, vector<1x1x8x90xf32>
    %15 = vector.shape_cast %14 : vector<1x1x8x90xf32> to vector<8x90xf32>
    %16 = tpu.transpose %15, [1, 0] : vector<8x90xf32> -> vector<90x8xf32>
    %c0_14 = arith.constant 0 : index
    %c0_15 = arith.constant 0 : index
    %17 = vector.load %arg1[%c0_14, %c0_15] : memref<8x10xf32, #tpu.memory_space<vmem>>, vector<8x10xf32>
    %cst_16 = arith.constant dense<0.000000e+00> : vector<90x10xf32>
    %18 = tpu.matmul %16, %17, %cst_16 {dimension_numbers = #tpu.dot_dimension_numbers<[1], [0], [0], [1], [0, 0, 1, 1], [], []>} : vector<90x8xf32>, vector<8x10xf32>, vector<90x10xf32> -> vector<90x10xf32>
    %c0_17 = arith.constant 0 : index
    %c0_18 = arith.constant 0 : index
    %19 = vector.load %arg2[%c0_17, %c0_18] : memref<1x10xf32, #tpu.memory_space<vmem>>, vector<1x10xf32>
    %20 = vector.broadcast %19 : vector<1x10xf32> to vector<90x10xf32>
    %21 = arith.addf %18, %20 : vector<90x10xf32>
    %cst_19 = arith.constant 0.666666686 : f32
    %22 = vector.broadcast %cst_19 : f32 to vector<90x10xf32>
    %23 = arith.mulf %22, %21 : vector<90x10xf32>
    %24 = math.tanh %23 : vector<90x10xf32>
    %cst_20 = arith.constant 1.715900e+00 : f32
    %25 = vector.broadcast %cst_20 : f32 to vector<90x10xf32>
    %26 = arith.mulf %25, %24 : vector<90x10xf32>
    %c90 = arith.constant 90 : index
    %c0_21 = arith.constant 0 : index
    %27 = vector.load %arg10[%c90, %c0_21] : memref<180x10xf32, #tpu.memory_space<vmem>>, vector<90x10xf32>
    tpu.vector_store %arg10[%c90, %c0_21], %26 {strides = array<i32>} : memref<180x10xf32, #tpu.memory_space<vmem>>, vector<90x10xf32>,
    %cst_22 = arith.constant 0.000000e+00 : f32
    %28 = vector.broadcast %cst_22 : f32 to vector<12x50xf32>
    %c0_23 = arith.constant 0 : index
    %c0_24 = arith.constant 0 : index
    %29 = tpu.strided_load %arg10[%c0_23, %c0_24] {strides = array<i32: 15, 1>} : memref<180x10xf32, #tpu.memory_space<vmem>>, vector<12x10xf32>
    %c0_25 = arith.constant 0 : index
    %c0_26 = arith.constant 0 : index
    %c0_27 = arith.constant 0 : index
    %30 = vector.load %arg3[%c0_25, %c0_26, %c0_27] : memref<15x10x50xf32, #tpu.memory_space<vmem>>, vector<1x10x50xf32>
    %31 = vector.shape_cast %30 : vector<1x10x50xf32> to vector<10x50xf32>
    %cst_28 = arith.constant dense<0.000000e+00> : vector<12x50xf32>
    %32 = tpu.matmul %29, %31, %cst_28 {dimension_numbers = #tpu.dot_dimension_numbers<[1], [0], [0], [1], [0, 0, 1, 1], [], []>} : vector<12x10xf32>, vector<10x50xf32>, vector<12x50xf32> -> vector<12x50xf32>
    %33 = arith.addf %28, %32 : vector<12x50xf32>
    %c1_29 = arith.constant 1 : index
    %c0_30 = arith.constant 0 : index
    %34 = tpu.strided_load %arg10[%c1_29, %c0_30] {strides = array<i32: 15, 1>} : memref<180x10xf32, #tpu.memory_space<vmem>>, vector<12x10xf32>
    %c1_31 = arith.constant 1 : index
    %c0_32 = arith.constant 0 : index
    %c0_33 = arith.constant 0 : index
    %35 = vector.load %arg3[%c1_31, %c0_32, %c0_33] : memref<15x10x50xf32, #tpu.memory_space<vmem>>, vector<1x10x50xf32>
    %36 = vector.shape_cast %35 : vector<1x10x50xf32> to vector<10x50xf32>
    %cst_34 = arith.constant dense<0.000000e+00> : vector<12x50xf32>
    %37 = tpu.matmul %34, %36, %cst_34 {dimension_numbers = #tpu.dot_dimension_numbers<[1], [0], [0], [1], [0, 0, 1, 1], [], []>} : vector<12x10xf32>, vector<10x50xf32>, vector<12x50xf32> -> vector<12x50xf32>
    %38 = arith.addf %33, %37 : vector<12x50xf32>
    %c2 = arith.constant 2 : index
    %c0_35 = arith.constant 0 : index
    %39 = tpu.strided_load %arg10[%c2, %c0_35] {strides = array<i32: 15, 1>} : memref<180x10xf32, #tpu.memory_space<vmem>>, vector<12x10xf32>
    %c2_36 = arith.constant 2 : index
    %c0_37 = arith.constant 0 : index
    %c0_38 = arith.constant 0 : index
    %40 = vector.load %arg3[%c2_36, %c0_37, %c0_38] : memref<15x10x50xf32, #tpu.memory_space<vmem>>, vector<1x10x50xf32>
    %41 = vector.shape_cast %40 : vector<1x10x50xf32> to vector<10x50xf32>
    %cst_39 = arith.constant dense<0.000000e+00> : vector<12x50xf32>
    %42 = tpu.matmul %39, %41, %cst_39 {dimension_numbers = #tpu.dot_dimension_numbers<[1], [0], [0], [1], [0, 0, 1, 1], [], []>} : vector<12x10xf32>, vector<10x50xf32>, vector<12x50xf32> -> vector<12x50xf32>
    %43 = arith.addf %38, %42 : vector<12x50xf32>
    %c3 = arith.constant 3 : index
    %c0_40 = arith.constant 0 : index
    %44 = tpu.strided_load %arg10[%c3, %c0_40] {strides = array<i32: 15, 1>} : memref<180x10xf32, #tpu.memory_space<vmem>>, vector<12x10xf32>
    %c3_41 = arith.constant 3 : index
    %c0_42 = arith.constant 0 : index
    %c0_43 = arith.constant 0 : index
    %45 = vector.load %arg3[%c3_41, %c0_42, %c0_43] : memref<15x10x50xf32, #tpu.memory_space<vmem>>, vector<1x10x50xf32>
    %46 = vector.shape_cast %45 : vector<1x10x50xf32> to vector<10x50xf32>
    %cst_44 = arith.constant dense<0.000000e+00> : vector<12x50xf32>
    %47 = tpu.matmul %44, %46, %cst_44 {dimension_numbers = #tpu.dot_dimension_numbers<[1], [0], [0], [1], [0, 0, 1, 1], [], []>} : vector<12x10xf32>, vector<10x50xf32>, vector<12x50xf32> -> vector<12x50xf32>
    %48 = arith.addf %43, %47 : vector<12x50xf32>
    %c4 = arith.constant 4 : index
    %c0_45 = arith.constant 0 : index
    %49 = tpu.strided_load %arg10[%c4, %c0_45] {strides = array<i32: 15, 1>} : memref<180x10xf32, #tpu.memory_space<vmem>>, vector<12x10xf32>
    %c4_46 = arith.constant 4 : index
    %c0_47 = arith.constant 0 : index
    %c0_48 = arith.constant 0 : index
    %50 = vector.load %arg3[%c4_46, %c0_47, %c0_48] : memref<15x10x50xf32, #tpu.memory_space<vmem>>, vector<1x10x50xf32>
    %51 = vector.shape_cast %50 : vector<1x10x50xf32> to vector<10x50xf32>
    %cst_49 = arith.constant dense<0.000000e+00> : vector<12x50xf32>
    %52 = tpu.matmul %49, %51, %cst_49 {dimension_numbers = #tpu.dot_dimension_numbers<[1], [0], [0], [1], [0, 0, 1, 1], [], []>} : vector<12x10xf32>, vector<10x50xf32>, vector<12x50xf32> -> vector<12x50xf32>
    %53 = arith.addf %48, %52 : vector<12x50xf32>
    %c5 = arith.constant 5 : index
    %c0_50 = arith.constant 0 : index
    %54 = tpu.strided_load %arg10[%c5, %c0_50] {strides = array<i32: 15, 1>} : memref<180x10xf32, #tpu.memory_space<vmem>>, vector<12x10xf32>
    %c5_51 = arith.constant 5 : index
    %c0_52 = arith.constant 0 : index
    %c0_53 = arith.constant 0 : index
    %55 = vector.load %arg3[%c5_51, %c0_52, %c0_53] : memref<15x10x50xf32, #tpu.memory_space<vmem>>, vector<1x10x50xf32>
    %56 = vector.shape_cast %55 : vector<1x10x50xf32> to vector<10x50xf32>
    %cst_54 = arith.constant dense<0.000000e+00> : vector<12x50xf32>
    %57 = tpu.matmul %54, %56, %cst_54 {dimension_numbers = #tpu.dot_dimension_numbers<[1], [0], [0], [1], [0, 0, 1, 1], [], []>} : vector<12x10xf32>, vector<10x50xf32>, vector<12x50xf32> -> vector<12x50xf32>
    %58 = arith.addf %53, %57 : vector<12x50xf32>
    %c6 = arith.constant 6 : index
    %c0_55 = arith.constant 0 : index
    %59 = tpu.strided_load %arg10[%c6, %c0_55] {strides = array<i32: 15, 1>} : memref<180x10xf32, #tpu.memory_space<vmem>>, vector<12x10xf32>
    %c6_56 = arith.constant 6 : index
    %c0_57 = arith.constant 0 : index
    %c0_58 = arith.constant 0 : index
    %60 = vector.load %arg3[%c6_56, %c0_57, %c0_58] : memref<15x10x50xf32, #tpu.memory_space<vmem>>, vector<1x10x50xf32>
    %61 = vector.shape_cast %60 : vector<1x10x50xf32> to vector<10x50xf32>
    %cst_59 = arith.constant dense<0.000000e+00> : vector<12x50xf32>
    %62 = tpu.matmul %59, %61, %cst_59 {dimension_numbers = #tpu.dot_dimension_numbers<[1], [0], [0], [1], [0, 0, 1, 1], [], []>} : vector<12x10xf32>, vector<10x50xf32>, vector<12x50xf32> -> vector<12x50xf32>
    %63 = arith.addf %58, %62 : vector<12x50xf32>
    %c7 = arith.constant 7 : index
    %c0_60 = arith.constant 0 : index
    %64 = tpu.strided_load %arg10[%c7, %c0_60] {strides = array<i32: 15, 1>} : memref<180x10xf32, #tpu.memory_space<vmem>>, vector<12x10xf32>
    %c7_61 = arith.constant 7 : index
    %c0_62 = arith.constant 0 : index
    %c0_63 = arith.constant 0 : index
    %65 = vector.load %arg3[%c7_61, %c0_62, %c0_63] : memref<15x10x50xf32, #tpu.memory_space<vmem>>, vector<1x10x50xf32>
    %66 = vector.shape_cast %65 : vector<1x10x50xf32> to vector<10x50xf32>
    %cst_64 = arith.constant dense<0.000000e+00> : vector<12x50xf32>
    %67 = tpu.matmul %64, %66, %cst_64 {dimension_numbers = #tpu.dot_dimension_numbers<[1], [0], [0], [1], [0, 0, 1, 1], [], []>} : vector<12x10xf32>, vector<10x50xf32>, vector<12x50xf32> -> vector<12x50xf32>
    %68 = arith.addf %63, %67 : vector<12x50xf32>
    %c8 = arith.constant 8 : index
    %c0_65 = arith.constant 0 : index
    %69 = tpu.strided_load %arg10[%c8, %c0_65] {strides = array<i32: 15, 1>} : memref<180x10xf32, #tpu.memory_space<vmem>>, vector<12x10xf32>
    %c8_66 = arith.constant 8 : index
    %c0_67 = arith.constant 0 : index
    %c0_68 = arith.constant 0 : index
    %70 = vector.load %arg3[%c8_66, %c0_67, %c0_68] : memref<15x10x50xf32, #tpu.memory_space<vmem>>, vector<1x10x50xf32>
    %71 = vector.shape_cast %70 : vector<1x10x50xf32> to vector<10x50xf32>
    %cst_69 = arith.constant dense<0.000000e+00> : vector<12x50xf32>
    %72 = tpu.matmul %69, %71, %cst_69 {dimension_numbers = #tpu.dot_dimension_numbers<[1], [0], [0], [1], [0, 0, 1, 1], [], []>} : vector<12x10xf32>, vector<10x50xf32>, vector<12x50xf32> -> vector<12x50xf32>
    %73 = arith.addf %68, %72 : vector<12x50xf32>
    %c9 = arith.constant 9 : index
    %c0_70 = arith.constant 0 : index
    %74 = tpu.strided_load %arg10[%c9, %c0_70] {strides = array<i32: 15, 1>} : memref<180x10xf32, #tpu.memory_space<vmem>>, vector<12x10xf32>
    %c9_71 = arith.constant 9 : index
    %c0_72 = arith.constant 0 : index
    %c0_73 = arith.constant 0 : index
    %75 = vector.load %arg3[%c9_71, %c0_72, %c0_73] : memref<15x10x50xf32, #tpu.memory_space<vmem>>, vector<1x10x50xf32>
    %76 = vector.shape_cast %75 : vector<1x10x50xf32> to vector<10x50xf32>
    %cst_74 = arith.constant dense<0.000000e+00> : vector<12x50xf32>
    %77 = tpu.matmul %74, %76, %cst_74 {dimension_numbers = #tpu.dot_dimension_numbers<[1], [0], [0], [1], [0, 0, 1, 1], [], []>} : vector<12x10xf32>, vector<10x50xf32>, vector<12x50xf32> -> vector<12x50xf32>
    %78 = arith.addf %73, %77 : vector<12x50xf32>
    %c10 = arith.constant 10 : index
    %c0_75 = arith.constant 0 : index
    %79 = tpu.strided_load %arg10[%c10, %c0_75] {strides = array<i32: 15, 1>} : memref<180x10xf32, #tpu.memory_space<vmem>>, vector<12x10xf32>
    %c10_76 = arith.constant 10 : index
    %c0_77 = arith.constant 0 : index
    %c0_78 = arith.constant 0 : index
    %80 = vector.load %arg3[%c10_76, %c0_77, %c0_78] : memref<15x10x50xf32, #tpu.memory_space<vmem>>, vector<1x10x50xf32>
    %81 = vector.shape_cast %80 : vector<1x10x50xf32> to vector<10x50xf32>
    %cst_79 = arith.constant dense<0.000000e+00> : vector<12x50xf32>
    %82 = tpu.matmul %79, %81, %cst_79 {dimension_numbers = #tpu.dot_dimension_numbers<[1], [0], [0], [1], [0, 0, 1, 1], [], []>} : vector<12x10xf32>, vector<10x50xf32>, vector<12x50xf32> -> vector<12x50xf32>
    %83 = arith.addf %78, %82 : vector<12x50xf32>
    %c11 = arith.constant 11 : index
    %c0_80 = arith.constant 0 : index
    %84 = tpu.strided_load %arg10[%c11, %c0_80] {strides = array<i32: 15, 1>} : memref<180x10xf32, #tpu.memory_space<vmem>>, vector<12x10xf32>
    %c11_81 = arith.constant 11 : index
    %c0_82 = arith.constant 0 : index
    %c0_83 = arith.constant 0 : index
    %85 = vector.load %arg3[%c11_81, %c0_82, %c0_83] : memref<15x10x50xf32, #tpu.memory_space<vmem>>, vector<1x10x50xf32>
    %86 = vector.shape_cast %85 : vector<1x10x50xf32> to vector<10x50xf32>
    %cst_84 = arith.constant dense<0.000000e+00> : vector<12x50xf32>
    %87 = tpu.matmul %84, %86, %cst_84 {dimension_numbers = #tpu.dot_dimension_numbers<[1], [0], [0], [1], [0, 0, 1, 1], [], []>} : vector<12x10xf32>, vector<10x50xf32>, vector<12x50xf32> -> vector<12x50xf32>
    %88 = arith.addf %83, %87 : vector<12x50xf32>
    %c12 = arith.constant 12 : index
    %c0_85 = arith.constant 0 : index
    %89 = tpu.strided_load %arg10[%c12, %c0_85] {strides = array<i32: 15, 1>} : memref<180x10xf32, #tpu.memory_space<vmem>>, vector<12x10xf32>
    %c12_86 = arith.constant 12 : index
    %c0_87 = arith.constant 0 : index
    %c0_88 = arith.constant 0 : index
    %90 = vector.load %arg3[%c12_86, %c0_87, %c0_88] : memref<15x10x50xf32, #tpu.memory_space<vmem>>, vector<1x10x50xf32>
    %91 = vector.shape_cast %90 : vector<1x10x50xf32> to vector<10x50xf32>
    %cst_89 = arith.constant dense<0.000000e+00> : vector<12x50xf32>
    %92 = tpu.matmul %89, %91, %cst_89 {dimension_numbers = #tpu.dot_dimension_numbers<[1], [0], [0], [1], [0, 0, 1, 1], [], []>} : vector<12x10xf32>, vector<10x50xf32>, vector<12x50xf32> -> vector<12x50xf32>
    %93 = arith.addf %88, %92 : vector<12x50xf32>
    %c13 = arith.constant 13 : index
    %c0_90 = arith.constant 0 : index
    %94 = tpu.strided_load %arg10[%c13, %c0_90] {strides = array<i32: 15, 1>} : memref<180x10xf32, #tpu.memory_space<vmem>>, vector<12x10xf32>
    %c13_91 = arith.constant 13 : index
    %c0_92 = arith.constant 0 : index
    %c0_93 = arith.constant 0 : index
    %95 = vector.load %arg3[%c13_91, %c0_92, %c0_93] : memref<15x10x50xf32, #tpu.memory_space<vmem>>, vector<1x10x50xf32>
    %96 = vector.shape_cast %95 : vector<1x10x50xf32> to vector<10x50xf32>
    %cst_94 = arith.constant dense<0.000000e+00> : vector<12x50xf32>
    %97 = tpu.matmul %94, %96, %cst_94 {dimension_numbers = #tpu.dot_dimension_numbers<[1], [0], [0], [1], [0, 0, 1, 1], [], []>} : vector<12x10xf32>, vector<10x50xf32>, vector<12x50xf32> -> vector<12x50xf32>
    %98 = arith.addf %93, %97 : vector<12x50xf32>
    %c14 = arith.constant 14 : index
    %c0_95 = arith.constant 0 : index
    %99 = tpu.strided_load %arg10[%c14, %c0_95] {strides = array<i32: 15, 1>} : memref<180x10xf32, #tpu.memory_space<vmem>>, vector<12x10xf32>
    %c14_96 = arith.constant 14 : index
    %c0_97 = arith.constant 0 : index
    %c0_98 = arith.constant 0 : index
    %100 = vector.load %arg3[%c14_96, %c0_97, %c0_98] : memref<15x10x50xf32, #tpu.memory_space<vmem>>, vector<1x10x50xf32>
    %101 = vector.shape_cast %100 : vector<1x10x50xf32> to vector<10x50xf32>
    %cst_99 = arith.constant dense<0.000000e+00> : vector<12x50xf32>
    %102 = tpu.matmul %99, %101, %cst_99 {dimension_numbers = #tpu.dot_dimension_numbers<[1], [0], [0], [1], [0, 0, 1, 1], [], []>} : vector<12x10xf32>, vector<10x50xf32>, vector<12x50xf32> -> vector<12x50xf32>
    %103 = arith.addf %98, %102 : vector<12x50xf32>
    %c0_100 = arith.constant 0 : index
    %c0_101 = arith.constant 0 : index
    %104 = vector.load %arg4[%c0_100, %c0_101] : memref<1x50xf32, #tpu.memory_space<vmem>>, vector<1x50xf32>
    %105 = vector.broadcast %104 : vector<1x50xf32> to vector<12x50xf32>
    %106 = arith.addf %103, %105 : vector<12x50xf32>
    %cst_102 = arith.constant 0.000000e+00 : f32
    %107 = vector.broadcast %cst_102 : f32 to vector<12x50xf32>
    %108 = arith.subf %107, %106 : vector<12x50xf32>
    %109 = math.exp %108 : vector<12x50xf32>
    %cst_103 = arith.constant 1.000000e+00 : f32
    %110 = vector.broadcast %cst_103 : f32 to vector<12x50xf32>
    %111 = arith.addf %110, %109 : vector<12x50xf32>
    %112 = tpu.reciprocal %111 {approx = true} : vector<12x50xf32> -> vector<12x50xf32>
    %c0_104 = arith.constant 0 : index
    %c0_105 = arith.constant 0 : index
    %113 = vector.load %arg11[%c0_104, %c0_105] : memref<12x50xf32, #tpu.memory_space<vmem>>, vector<12x50xf32>
    tpu.vector_store %arg11[%c0_104, %c0_105], %112 {strides = array<i32>} : memref<12x50xf32, #tpu.memory_space<vmem>>, vector<12x50xf32>,
    %c0_106 = arith.constant 0 : index
    %c0_107 = arith.constant 0 : index
    %114 = vector.load %arg6[%c0_106, %c0_107] : memref<1x100xf32, #tpu.memory_space<vmem>>, vector<1x100xf32>
    %c0_108 = arith.constant 0 : index
    %c0_109 = arith.constant 0 : index
    %115 = tpu.strided_load %arg11[%c0_108, %c0_109] {strides = array<i32: 6, 1>} : memref<12x50xf32, #tpu.memory_space<vmem>>, vector<2x50xf32>
    %c0_110 = arith.constant 0 : index
    %c0_111 = arith.constant 0 : index
    %c0_112 = arith.constant 0 : index
    %116 = vector.load %arg5[%c0_110, %c0_111, %c0_112] : memref<6x50x100xf32, #tpu.memory_space<vmem>>, vector<1x50x100xf32>
    %117 = vector.shape_cast %116 : vector<1x50x100xf32> to vector<50x100xf32>
    %cst_113 = arith.constant dense<0.000000e+00> : vector<2x100xf32>
    %118 = tpu.matmul %115, %117, %cst_113 {dimension_numbers = #tpu.dot_dimension_numbers<[1], [0], [0], [1], [0, 0, 1, 1], [], []>} : vector<2x50xf32>, vector<50x100xf32>, vector<2x100xf32> -> vector<2x100xf32>
    %119 = vector.broadcast %114 : vector<1x100xf32> to vector<2x100xf32>
    %120 = arith.addf %119, %118 : vector<2x100xf32>
    %c1_114 = arith.constant 1 : index
    %c0_115 = arith.constant 0 : index
    %121 = tpu.strided_load %arg11[%c1_114, %c0_115] {strides = array<i32: 6, 1>} : memref<12x50xf32, #tpu.memory_space<vmem>>, vector<2x50xf32>
    %c1_116 = arith.constant 1 : index
    %c0_117 = arith.constant 0 : index
    %c0_118 = arith.constant 0 : index
    %122 = vector.load %arg5[%c1_116, %c0_117, %c0_118] : memref<6x50x100xf32, #tpu.memory_space<vmem>>, vector<1x50x100xf32>
    %123 = vector.shape_cast %122 : vector<1x50x100xf32> to vector<50x100xf32>
    %cst_119 = arith.constant dense<0.000000e+00> : vector<2x100xf32>
    %124 = tpu.matmul %121, %123, %cst_119 {dimension_numbers = #tpu.dot_dimension_numbers<[1], [0], [0], [1], [0, 0, 1, 1], [], []>} : vector<2x50xf32>, vector<50x100xf32>, vector<2x100xf32> -> vector<2x100xf32>
    %125 = arith.addf %120, %124 : vector<2x100xf32>
    %c2_120 = arith.constant 2 : index
    %c0_121 = arith.constant 0 : index
    %126 = tpu.strided_load %arg11[%c2_120, %c0_121] {strides = array<i32: 6, 1>} : memref<12x50xf32, #tpu.memory_space<vmem>>, vector<2x50xf32>
    %c2_122 = arith.constant 2 : index
    %c0_123 = arith.constant 0 : index
    %c0_124 = arith.constant 0 : index
    %127 = vector.load %arg5[%c2_122, %c0_123, %c0_124] : memref<6x50x100xf32, #tpu.memory_space<vmem>>, vector<1x50x100xf32>
    %128 = vector.shape_cast %127 : vector<1x50x100xf32> to vector<50x100xf32>
    %cst_125 = arith.constant dense<0.000000e+00> : vector<2x100xf32>
    %129 = tpu.matmul %126, %128, %cst_125 {dimension_numbers = #tpu.dot_dimension_numbers<[1], [0], [0], [1], [0, 0, 1, 1], [], []>} : vector<2x50xf32>, vector<50x100xf32>, vector<2x100xf32> -> vector<2x100xf32>
    %130 = arith.addf %125, %129 : vector<2x100xf32>
    %c3_126 = arith.constant 3 : index
    %c0_127 = arith.constant 0 : index
    %131 = tpu.strided_load %arg11[%c3_126, %c0_127] {strides = array<i32: 6, 1>} : memref<12x50xf32, #tpu.memory_space<vmem>>, vector<2x50xf32>
    %c3_128 = arith.constant 3 : index
    %c0_129 = arith.constant 0 : index
    %c0_130 = arith.constant 0 : index
    %132 = vector.load %arg5[%c3_128, %c0_129, %c0_130] : memref<6x50x100xf32, #tpu.memory_space<vmem>>, vector<1x50x100xf32>
    %133 = vector.shape_cast %132 : vector<1x50x100xf32> to vector<50x100xf32>
    %cst_131 = arith.constant dense<0.000000e+00> : vector<2x100xf32>
    %134 = tpu.matmul %131, %133, %cst_131 {dimension_numbers = #tpu.dot_dimension_numbers<[1], [0], [0], [1], [0, 0, 1, 1], [], []>} : vector<2x50xf32>, vector<50x100xf32>, vector<2x100xf32> -> vector<2x100xf32>
    %135 = arith.addf %130, %134 : vector<2x100xf32>
    %c4_132 = arith.constant 4 : index
    %c0_133 = arith.constant 0 : index
    %136 = tpu.strided_load %arg11[%c4_132, %c0_133] {strides = array<i32: 6, 1>} : memref<12x50xf32, #tpu.memory_space<vmem>>, vector<2x50xf32>
    %c4_134 = arith.constant 4 : index
    %c0_135 = arith.constant 0 : index
    %c0_136 = arith.constant 0 : index
    %137 = vector.load %arg5[%c4_134, %c0_135, %c0_136] : memref<6x50x100xf32, #tpu.memory_space<vmem>>, vector<1x50x100xf32>
    %138 = vector.shape_cast %137 : vector<1x50x100xf32> to vector<50x100xf32>
    %cst_137 = arith.constant dense<0.000000e+00> : vector<2x100xf32>
    %139 = tpu.matmul %136, %138, %cst_137 {dimension_numbers = #tpu.dot_dimension_numbers<[1], [0], [0], [1], [0, 0, 1, 1], [], []>} : vector<2x50xf32>, vector<50x100xf32>, vector<2x100xf32> -> vector<2x100xf32>
    %140 = arith.addf %135, %139 : vector<2x100xf32>
    %c5_138 = arith.constant 5 : index
    %c0_139 = arith.constant 0 : index
    %141 = tpu.strided_load %arg11[%c5_138, %c0_139] {strides = array<i32: 6, 1>} : memref<12x50xf32, #tpu.memory_space<vmem>>, vector<2x50xf32>
    %c5_140 = arith.constant 5 : index
    %c0_141 = arith.constant 0 : index
    %c0_142 = arith.constant 0 : index
    %142 = vector.load %arg5[%c5_140, %c0_141, %c0_142] : memref<6x50x100xf32, #tpu.memory_space<vmem>>, vector<1x50x100xf32>
    %143 = vector.shape_cast %142 : vector<1x50x100xf32> to vector<50x100xf32>
    %cst_143 = arith.constant dense<0.000000e+00> : vector<2x100xf32>
    %144 = tpu.matmul %141, %143, %cst_143 {dimension_numbers = #tpu.dot_dimension_numbers<[1], [0], [0], [1], [0, 0, 1, 1], [], []>} : vector<2x50xf32>, vector<50x100xf32>, vector<2x100xf32> -> vector<2x100xf32>
    %145 = arith.addf %140, %144 : vector<2x100xf32>
    %cst_144 = arith.constant 0.000000e+00 : f32
    %146 = vector.broadcast %cst_144 : f32 to vector<2x100xf32>
    %147 = arith.subf %146, %145 : vector<2x100xf32>
    %148 = math.exp %147 : vector<2x100xf32>
    %cst_145 = arith.constant 1.000000e+00 : f32
    %149 = vector.broadcast %cst_145 : f32 to vector<2x100xf32>
    %150 = arith.addf %149, %148 : vector<2x100xf32>
    %151 = tpu.reciprocal %150 {approx = true} : vector<2x100xf32> -> vector<2x100xf32>
    %c0_146 = arith.constant 0 : index
    %c0_147 = arith.constant 0 : index
    %152 = vector.load %arg7[%c0_146, %c0_147] : memref<100x2xf32, #tpu.memory_space<vmem>>, vector<100x2xf32>
    %cst_148 = arith.constant dense<0.000000e+00> : vector<2x2xf32>
    %153 = tpu.matmul %151, %152, %cst_148 {dimension_numbers = #tpu.dot_dimension_numbers<[1], [0], [0], [1], [0, 0, 1, 1], [], []>} : vector<2x100xf32>, vector<100x2xf32>, vector<2x2xf32> -> vector<2x2xf32>
    %c0_149 = arith.constant 0 : index
    %c0_150 = arith.constant 0 : index
    %154 = vector.load %arg8[%c0_149, %c0_150] : memref<1x2xf32, #tpu.memory_space<vmem>>, vector<1x2xf32>
    %155 = vector.broadcast %154 : vector<1x2xf32> to vector<2x2xf32>
    %156 = arith.addf %153, %155 : vector<2x2xf32>
    %cst_151 = arith.constant 0.000000e+00 : f32
    %157 = vector.broadcast %cst_151 : f32 to vector<2x2xf32>
    %158 = arith.subf %157, %156 : vector<2x2xf32>
    %159 = math.exp %158 : vector<2x2xf32>
    %cst_152 = arith.constant 1.000000e+00 : f32
    %160 = vector.broadcast %cst_152 : f32 to vector<2x2xf32>
    %161 = arith.addf %160, %159 : vector<2x2xf32>
    %162 = tpu.reciprocal %161 {approx = true} : vector<2x2xf32> -> vector<2x2xf32>
    %c0_153 = arith.constant 0 : index
    %c0_154 = arith.constant 0 : index
    %163 = vector.load %arg9[%c0_153, %c0_154] : memref<2x2xf32, #tpu.memory_space<vmem>>, vector<2x2xf32>
    tpu.vector_store %arg9[%c0_153, %c0_154], %162 {strides = array<i32>} : memref<2x2xf32, #tpu.memory_space<vmem>>, vector<2x2xf32>,
    return
  }
}

</mosaic_0001>

<bundles_post_ra>
// kernel: net_nonsquare_forward.1
= control target key start
LH: loop header
LB: loop body
LE: loop exit
PB: predicated region body
PF: predicated region fallthrough
CT: control target
= control target key end

     0   :  { %s3824_s0 = inlined_call_operand.vmem [shape: f32[2,1,8,90], index: 0, kind: input, shape index: {}]   ;;  %s3825_s1 = inlined_call_operand.vmem [shape: f32[8,10], index: 1, kind: input, shape index: {}]   ;;  %s3826_s2 = inlined_call_operand.vmem [shape: f32[1,10], index: 2, kind: input, shape index: {}]   ;;  %s3827_s3 = inlined_call_operand.vmem [shape: f32[15,10,50], index: 3, kind: input, shape index: {}]   ;;  %s3828_s4 = inlined_call_operand.vmem [shape: f32[1,50], index: 4, kind: input, shape index: {}]   ;;  %s3829_s5 = inlined_call_operand.vmem [shape: f32[6,50,100], index: 5, kind: input, shape index: {}]   ;;  %s3830_s6 = inlined_call_operand.vmem [shape: f32[1,100], index: 6, kind: input, shape index: {}]   ;;  %s3831_s7 = inlined_call_operand.vmem [shape: f32[100,2], index: 7, kind: input, shape index: {}]   ;;  %s3832_s8 = inlined_call_operand.vmem [shape: f32[1,2], index: 8, kind: input, shape index: {}]   ;;  %s3833_s9 = inlined_call_operand.hbm [shape: f32[2,2], index: 9, kind: output, shape index: {}]  }
   0x1   :  { %v33_v0 = vld [vmem:[%s3824_s0] sm:$0xff] }
   0x2   :  { %v66_v1 = vld [vmem:[%s3825_s1] sm:$0xff]  ;;  %34 = vxpose.xlu0.b32.start.end [1/1] (short) (narrow) %v33_v0, 96 }
   0x3   :  { %2901 = vmatprep.subr.mxu0 %v66_v1 }
   0x4   :  { %14 = vsyncpa [#allocation5], 0  ;;  %2902 = vmatpush3.msra.mxu0 %v66_v1  ;;  %3177 = vmatprep.subr.mxu1 %v66_v1  ;;  %v2614_v2 = vld [vmem:[%s3824_s0 + $0x8] sm:$0xff]  ;;  %vm74_vm0 = vcmask 64512   ;;  %v2629_v27 = vld [vmem:[%s3827_s3 + $0x18] sm:$0x3] }
   0x5   :  { %2921 = vmatprep.subr.mxu0 %v66_v1  ;;  %3178 = vmatpush3.msra.mxu1 %v66_v1  ;;  %vm555_vm1 = vcmask 1041408   ;;  %v2642_v28 = vld [vmem:[%s3827_s3 + $0x38] sm:$0x3]  ;;  %v2628_v29 = vld [vmem:[%s3827_s3 + $0x10] sm:$0xff]  ;;  %v3373_v31 = vld [vmem:[%s3827_s3 + $0x8] sm:$0x3] }
   0x6   :  { %2962 = vmatprep.subr.msk.mxu1 %vm555_vm1, %v2642_v28  ;;  %v2641_v30 = vld [vmem:[%s3827_s3 + $0x30] sm:$0xff]  ;;  %v3380_v32 = vld [vmem:[%s3827_s3 + $0x58] sm:$0x3]  ;;  %v3387_v33 = vld [vmem:[%s3826_s2] ss:$0 sm:$0xff]  ;;  %vm272_vm2 = vcmask 80896  }
   0x7   :  { %vm284_vm3 = vcmask 74752   ;;  %vm3269_vm4 = vmmov 0   ;;  %vm1948_vm5 = vcmask 404480   ;;  %vm1946_vm6 = vcmask 408576   ;;  %s3270_s12 = smov [#allocation4]  }
   0x8   :  { %vm2506_vm7 = vcmask 1043456   ;;  %vm2502_vm8 = vcmask 818176   ;;  %s2593_s13 = sshll.u32 %s3270_s12, 4  ;;  %vm2585_vm9 = vcmask 9216   ;;  %s2594_s13 = int_to_ptr.vmem [resolvable:$true] %s2593_s13 }
   0x9   :  { %s3246_s14 = scalar_lea.vmem %s2594_s13, 32  ;;  %p3251_p1 = scmp.lt.s32.totalorder %s2594_s13, %s2594_s13 }
   0xa   :  { %p3247_p0 = scmp.ne.s32.totalorder %s2594_s13, %s3246_s14  ;;  %p3252_p2 = scmp.lt.s32.totalorder %s3246_s14, %s3246_s14 }
   0xc   :  { %p3253_p3 = por %p3252_p2, %p3251_p1 }
   0xe   :  { %p3254_p4 = pnand %p3253_p3, %p3247_p0 }
  0x2f   :  { %288 = vxpose.xlu0.b32.start.end [1/1] (short) (narrow) %v2614_v2, 96 }
  0x7e   :  { %v50_v3 = vpop.trf.xlu0 }
  0x7f   :  { %2903 = vmatprep.mubr.msk.f32.mxu0 %vm74_vm0, %v50_v3 }
  0x82   :  { %v51_v4 = vpop.trf.xlu0 }
  0x83   :  { %2904 = vmatmul.mubr.msk.f32.vlgmr.msra.gmra.mxu0 %vm74_vm0, %v51_v4 }
  0x84   :  { %2922 = vmatpush3.msra.mxu0 %v66_v1 }
  0x85   :  { %2941 = vmatprep.subr.msk.mxu0 %vm555_vm1, %v2629_v27 }
  0x86   :  { %v52_v5 = vpop.trf.xlu0 }
  0x87   :  { %2906 = vmatprep.mubr.msk.f32.mxu0 %vm74_vm0, %v52_v5 }
  0x8a   :  { %v53_v6 = vpop.trf.xlu0 }
  0x8b   :  { %2907 = vmatmul.mubr.msk.f32.gmra.mxu0 %vm74_vm0, %v53_v6 }
  0x8e   :  { %v54_v7 = vpop.trf.xlu0 }
  0x8f   :  { %2909 = vmatprep.mubr.msk.f32.mxu0 %vm74_vm0, %v54_v7 }
  0x92   :  { %v55_v8 = vpop.trf.xlu0 }
  0x93   :  { %2910 = vmatmul.mubr.msk.f32.gmra.mxu0 %vm74_vm0, %v55_v8 }
  0x96   :  { %v56_v9 = vpop.trf.xlu0 }
  0x97   :  { %2912 = vmatprep.mubr.msk.f32.mxu0 %vm74_vm0, %v56_v9 }
  0x9a   :  { %v57_v10 = vpop.trf.xlu0 }
  0x9b   :  { %2913 = vmatmul.mubr.msk.f32.gmra.mxu0 %vm74_vm0, %v57_v10 }
  0x9e   :  { %v58_v11 = vpop.trf.xlu0 }
  0x9f   :  { %2915 = vmatprep.mubr.msk.f32.mxu0 %vm74_vm0, %v58_v11 }
  0xa2   :  { %v59_v12 = vpop.trf.xlu0 }
  0xa3   :  { %2916 = vmatmul.mubr.msk.f32.gmra.mxu0 %vm74_vm0, %v59_v12 }
  0xa6   :  { %v60_v13 = vpop.trf.xlu0 }
  0xa7   :  { %2918 = vmatprep.mubr.msk.f32.mxu0 %vm74_vm0, %v60_v13 }
  0xaa   :  { %v61_v14 = vpop.trf.xlu0 }
  0xab   :  { %2919 = vmatmul.mubr.msk.f32.gmra.mxu0 %vm74_vm0, %v61_v14 }
  0xae   :  { %v304_v15 = vpop.trf.xlu0 }
  0xaf   :  { %2923 = vmatprep.mubr.msk.f32.mxu0 %vm74_vm0, %v304_v15 }
  0xb2   :  { %v305_v16 = vpop.trf.xlu0 }
  0xb3   :  { %2924 = vmatmul.mubr.msk.f32.vlgmr.msra.gmra.mxu0 %vm74_vm0, %v305_v16 }
  0xb4   :  { %2942 = vmatpush3.msk.msra.mxu0 %vm555_vm1, %v2629_v27 }
  0xb5   :  { %2943 = vmatprep.subr.mxu0 %v2628_v29 }
  0xb6   :  { %v306_v17 = vpop.trf.xlu0  ;;  %2944 = vmatpush3.msra.mxu0 %v2628_v29 }
  0xb7   :  { %2926 = vmatprep.mubr.msk.f32.mxu0 %vm74_vm0, %v306_v17  ;;  %2948 = vmatprep.subr.msk.mxu0 %vm555_vm1, %v3373_v31 }
  0xba   :  { %v307_v18 = vpop.trf.xlu0 }
  0xbb   :  { %2927 = vmatmul.mubr.msk.f32.gmra.mxu0 %vm74_vm0, %v307_v18 }
  0xbe   :  { %v308_v19 = vpop.trf.xlu0 }
  0xbf   :  { %2929 = vmatprep.mubr.msk.f32.mxu1 %vm74_vm0, %v308_v19 }
  0xc2   :  { %v309_v20 = vpop.trf.xlu0 }
  0xc3   :  { %2930 = vmatmul.mubr.msk.f32.vlgmr.msra.gmra.mxu1 %vm74_vm0, %v309_v20 }
  0xc4   :  { %2963 = vmatpush3.msk.msra.mxu1 %vm555_vm1, %v2642_v28 }
  0xc5   :  { %2964 = vmatprep.subr.mxu1 %v2641_v30 }
  0xc6   :  { %v310_v21 = vpop.trf.xlu0  ;;  %2965 = vmatpush3.msra.mxu1 %v2641_v30 }
  0xc7   :  { %2932 = vmatprep.mubr.msk.f32.mxu1 %vm74_vm0, %v310_v21  ;;  %2976 = vmatprep.subr.msk.mxu1 %vm555_vm1, %v3380_v32 }
  0xca   :  { %v311_v22 = vpop.trf.xlu0 }
  0xcb   :  { %2933 = vmatmul.mubr.msk.f32.gmra.mxu1 %vm74_vm0, %v311_v22 }
  0xce   :  { %v312_v23 = vpop.trf.xlu0 }
  0xcf   :  { %2935 = vmatprep.mubr.msk.f32.mxu1 %vm74_vm0, %v312_v23 }
  0xd2   :  { %v313_v24 = vpop.trf.xlu0 }
  0xd3   :  { %2936 = vmatmul.mubr.msk.f32.gmra.mxu1 %vm74_vm0, %v313_v24 }
  0xd6   :  { %v314_v25 = vpop.trf.xlu0 }
  0xd7   :  { %2938 = vmatprep.mubr.msk.f32.mxu1 %vm74_vm0, %v314_v25 }
  0xda   :  { %v315_v26 = vpop.trf.xlu0 }
  0xdb   :  { %2939 = vmatmul.mubr.msk.f32.gmra.mxu1 %vm74_vm0, %v315_v26 }
 0x143   :  { %v2905_v34 = vpop.f32.mrf.mxu0 }
 0x144   :  { %v183_v35 = vadd.f32 %v2905_v34, %v3387_v33 }
 0x145   :  { %v177_v36 = vpop.f32.mrf.mxu0 }
 0x146   :  { %v237_v37 = vmul.f32 0.6666667, %v183_v35  ;;  %v178_v38 = vadd.f32 %v3387_v33, %v177_v36 }
 0x148   :  { %3182 = vtanh.f32 %v237_v37  ;;  %v236_v39 = vmul.f32 0.6666667, %v178_v38 }
 0x14a   :  { %3184 = vtanh.f32 %v236_v39 }
 0x14b   :  { %v2908_v40 = vpop.f32.mrf.mxu0 }
 0x14c   :  { %v193_v41 = vadd.f32 %v2908_v40, %v3387_v33 }
 0x14d   :  { %v187_v42 = vpop.f32.mrf.mxu0 }
 0x14e   :  { %v239_v43 = vmul.f32 0.6666667, %v193_v41  ;;  %v188_v44 = vadd.f32 %v3387_v33, %v187_v42 }
 0x150   :  { %3186 = vtanh.f32 %v239_v43  ;;  %v238_v45 = vmul.f32 0.6666667, %v188_v44 }
 0x152   :  { %3188 = vtanh.f32 %v238_v45 }
 0x153   :  { %v2911_v46 = vpop.f32.mrf.mxu0 }
 0x154   :  { %v203_v47 = vadd.f32 %v2911_v46, %v3387_v33 }
 0x155   :  { %v3183_v48 = vpop.eup %3182  ;;  %v197_v49 = vpop.f32.mrf.mxu0 }
 0x156   :  { %v261_v50 = vmul.f32 1.7159, %v3183_v48  ;;  %v241_v51 = vmul.f32 0.6666667, %v203_v47  ;;  %v198_v52 = vadd.f32 %v3387_v33, %v197_v49 }
 0x157   :  { %v3185_v53 = vpop.eup %3184 }
 0x158   :  { %274 = vst.msk [vmem:[#allocation2 + $0x8] sm:$0xff] %vm272_vm2, %v261_v50  ;;  %v260_v54 = vmul.f32 1.7159, %v3185_v53  ;;  %3190 = vtanh.f32 %v241_v51  ;;  %v240_v55 = vmul.f32 0.6666667, %v198_v52 }
 0x15a   :  { %273 = vst.msk [vmem:[#allocation2] sm:$0xff] %vm272_vm2, %v260_v54  ;;  %3192 = vtanh.f32 %v240_v55 }
 0x15b   :  { %v2914_v56 = vpop.f32.mrf.mxu0 }
 0x15c   :  { %v213_v57 = vadd.f32 %v2914_v56, %v3387_v33 }
 0x15d   :  { %v3187_v58 = vpop.eup %3186  ;;  %v207_v59 = vpop.f32.mrf.mxu0 }
 0x15e   :  { %v263_v60 = vmul.f32 1.7159, %v3187_v58  ;;  %v243_v61 = vmul.f32 0.6666667, %v213_v57  ;;  %v208_v62 = vadd.f32 %v3387_v33, %v207_v59 }
 0x15f   :  { %v3189_v63 = vpop.eup %3188 }
 0x160   :  { %276 = vst.msk [vmem:[#allocation2 + $0x18] sm:$0xff] %vm272_vm2, %v263_v60  ;;  %v262_v0 = vmul.f32 1.7159, %v3189_v63  ;;  %3194 = vtanh.f32 %v243_v61  ;;  %v242_v1 = vmul.f32 0.6666667, %v208_v62 }
 0x162   :  { %275 = vst.msk [vmem:[#allocation2 + $0x10] sm:$0xff] %vm272_vm2, %v262_v0  ;;  %3196 = vtanh.f32 %v242_v1 }
 0x163   :  { %v2917_v2 = vpop.f32.mrf.mxu0 }
 0x164   :  { %v223_v3 = vadd.f32 %v2917_v2, %v3387_v33 }
 0x165   :  { %v3191_v4 = vpop.eup %3190  ;;  %v217_v5 = vpop.f32.mrf.mxu0 }
 0x166   :  { %v265_v6 = vmul.f32 1.7159, %v3191_v4  ;;  %v245_v7 = vmul.f32 0.6666667, %v223_v3  ;;  %v218_v8 = vadd.f32 %v3387_v33, %v217_v5 }
 0x167   :  { %v3193_v9 = vpop.eup %3192 }
 0x168   :  { %278 = vst.msk [vmem:[#allocation2 + $0x28] sm:$0xff] %vm272_vm2, %v265_v6  ;;  %v264_v10 = vmul.f32 1.7159, %v3193_v9  ;;  %3198 = vtanh.f32 %v245_v7  ;;  %v244_v11 = vmul.f32 0.6666667, %v218_v8 }
 0x16a   :  { %277 = vst.msk [vmem:[#allocation2 + $0x20] sm:$0xff] %vm272_vm2, %v264_v10  ;;  %3200 = vtanh.f32 %v244_v11 }
 0x16b   :  { %v2920_v12 = vpop.f32.mrf.mxu0 }
 0x16c   :  { %v233_v13 = vadd.f32 %v2920_v12, %v3387_v33 }
 0x16d   :  { %v3195_v14 = vpop.eup %3194  ;;  %v227_v15 = vpop.f32.mrf.mxu0 }
 0x16e   :  { %v267_v16 = vmul.f32 1.7159, %v3195_v14  ;;  %v247_v17 = vmul.f32 0.6666667, %v233_v13  ;;  %v228_v18 = vadd.f32 %v3387_v33, %v227_v15 }
 0x16f   :  { %v3197_v19 = vpop.eup %3196 }
 0x170   :  { %280 = vst.msk [vmem:[#allocation2 + $0x38] sm:$0xff] %vm272_vm2, %v267_v16  ;;  %v266_v20 = vmul.f32 1.7159, %v3197_v19  ;;  %3202 = vtanh.f32 %v247_v17  ;;  %v246_v21 = vmul.f32 0.6666667, %v228_v18 }
 0x172   :  { %279 = vst.msk [vmem:[#allocation2 + $0x30] sm:$0xff] %vm272_vm2, %v266_v20  ;;  %3204 = vtanh.f32 %v246_v21 }
 0x173   :  { %v2925_v22 = vpop.f32.mrf.mxu0 }
 0x174   :  { %v436_v23 = vadd.f32 %v2925_v22, %v3387_v33 }
 0x175   :  { %v3199_v24 = vpop.eup %3198  ;;  %v430_v25 = vpop.f32.mrf.mxu0 }
 0x176   :  { %v269_v26 = vmul.f32 1.7159, %v3199_v24  ;;  %v490_v27 = vmul.f32 0.6666667, %v436_v23  ;;  %v431_v28 = vadd.f32 %v3387_v33, %v430_v25 }
 0x177   :  { %v3201_v29 = vpop.eup %3200 }
 0x178   :  { %282 = vst.msk [vmem:[#allocation2 + $0x48] sm:$0xff] %vm272_vm2, %v269_v26  ;;  %v268_v30 = vmul.f32 1.7159, %v3201_v29  ;;  %3206 = vtanh.f32 %v490_v27  ;;  %v489_v34 = vmul.f32 0.6666667, %v431_v28 }
 0x17a   :  { %281 = vst.msk [vmem:[#allocation2 + $0x40] sm:$0xff] %vm272_vm2, %v268_v30  ;;  %3208 = vtanh.f32 %v489_v34 }
 0x17b   :  { %v2928_v35 = vpop.f32.mrf.mxu0 }
 0x17c   :  { %v446_v36 = vadd.f32 %v2928_v35, %v3387_v33 }
 0x17d   :  { %v3203_v37 = vpop.eup %3202  ;;  %v440_v38 = vpop.f32.mrf.mxu0 }
 0x17e   :  { %v271_v39 = vmul.f32 1.7159, %v3203_v37  ;;  %v492_v40 = vmul.f32 0.6666667, %v446_v36  ;;  %v441_v41 = vadd.f32 %v3387_v33, %v440_v38  ;;  %v2637_v38 = vld [vmem:[%s3827_s3 + $0x28] sm:$0x3] }
 0x17f   :  { %v3205_v42 = vpop.eup %3204 }
 0x180   :  { %285 = vst.msk [vmem:[#allocation2 + $0x58] sm:$0x3] %vm284_vm3, %v271_v39  ;;  %v270_v43 = vmul.f32 1.7159, %v3205_v42  ;;  %3210 = vtanh.f32 %v492_v40  ;;  %v491_v44 = vmul.f32 0.6666667, %v441_v41 }
 0x181   :  { %v2636_v40 = vld [vmem:[%s3827_s3 + $0x20] sm:$0xff]  ;;  %v2647_v42 = vld [vmem:[%s3827_s3 + $0x48] sm:$0x3] }
 0x182   :  { %283 = vst.msk [vmem:[#allocation2 + $0x50] sm:$0xff] %vm272_vm2, %v270_v43  ;;  %3212 = vtanh.f32 %v491_v44  ;;  %v2646_v43 = vld [vmem:[%s3827_s3 + $0x40] sm:$0xff] }
 0x183   :  { %v2931_v45 = vpop.f32.mrf.mxu1 }
 0x184   :  { %v456_v46 = vadd.f32 %v2931_v45, %v3387_v33  ;;  %v2662_v45 = vld [vmem:[%s3827_s3 + $0x78] sm:$0x3] }
 0x185   :  { %v3207_v47 = vpop.eup %3206  ;;  %v450_v48 = vpop.f32.mrf.mxu1 }
 0x186   :  { %v514_v49 = vmul.f32 1.7159, %v3207_v47  ;;  %v494_v50 = vmul.f32 0.6666667, %v456_v46  ;;  %v451_v51 = vadd.f32 %v3387_v33, %v450_v48  ;;  %v2657_v47 = vld [vmem:[%s3827_s3 + $0x68] sm:$0x3] }
 0x187   :  { %v3209_v52 = vpop.eup %3208  ;;  %v2661_v48 = vld [vmem:[%s3827_s3 + $0x70] sm:$0xff] }
 0x188   :  { %526 = vst.msk [vmem:[#allocation2 + $0x62] sm:$0xff] %vm272_vm2, %v514_v49  ;;  %v513_v53 = vmul.f32 1.7159, %v3209_v52  ;;  %3214 = vtanh.f32 %v494_v50  ;;  %v493_v54 = vmul.f32 0.6666667, %v451_v51  ;;  %v2656_v51 = vld [vmem:[%s3827_s3 + $0x60] sm:$0xff] }
 0x18a   :  { %525 = vst.msk [vmem:[#allocation2 + $0x5a] sm:$0xff] %vm272_vm2, %v513_v53  ;;  %3216 = vtanh.f32 %v493_v54  ;;  %v2672_v53 = vld [vmem:[%s3827_s3 + $0x98] sm:$0x3]  ;;  %v2667_v54 = vld [vmem:[%s3827_s3 + $0x88] sm:$0x3] }
 0x18b   :  { %v2934_v55 = vpop.f32.mrf.mxu1 }
 0x18c   :  { %v466_v56 = vadd.f32 %v2934_v55, %v3387_v33 }
 0x18d   :  { %v3211_v57 = vpop.eup %3210  ;;  %v460_v58 = vpop.f32.mrf.mxu1 }
 0x18e   :  { %v516_v59 = vmul.f32 1.7159, %v3211_v57  ;;  %v496_v60 = vmul.f32 0.6666667, %v466_v56  ;;  %v461_v61 = vadd.f32 %v3387_v33, %v460_v58  ;;  %v2671_v56 = vld [vmem:[%s3827_s3 + $0x90] sm:$0xff] }
 0x18f   :  { %v3213_v62 = vpop.eup %3212 }
 0x190   :  { %528 = vst.msk [vmem:[#allocation2 + $0x72] sm:$0xff] %vm272_vm2, %v516_v59  ;;  %v515_v63 = vmul.f32 1.7159, %v3213_v62  ;;  %3218 = vtanh.f32 %v496_v60  ;;  %v495_v0 = vmul.f32 0.6666667, %v461_v61  ;;  %v2666_v59 = vld [vmem:[%s3827_s3 + $0x80] sm:$0xff] }
 0x191   :  { %v537_v36 = vld [vmem:[#allocation2] ss:$15 sm:$0xff]  ;;  %v2682_v61 = vld [vmem:[%s3827_s3 + $0xb8] sm:$0x3] }
 0x192   :  { %527 = vst.msk [vmem:[#allocation2 + $0x6a] sm:$0xff] %vm272_vm2, %v515_v63  ;;  %3220 = vtanh.f32 %v495_v0  ;;  %v2677_v62 = vld [vmem:[%s3827_s3 + $0xa8] sm:$0x3]  ;;  %v2681_v0 = vld [vmem:[%s3827_s3 + $0xb0] sm:$0xff] }
 0x193   :  { %v2937_v1 = vpop.f32.mrf.mxu1 }
 0x194   :  { %v476_v2 = vadd.f32 %v2937_v1, %v3387_v33 }
 0x195   :  { %v3215_v3 = vpop.eup %3214  ;;  %v470_v4 = vpop.f32.mrf.mxu1 }
 0x196   :  { %v518_v5 = vmul.f32 1.7159, %v3215_v3  ;;  %v498_v6 = vmul.f32 0.6666667, %v476_v2  ;;  %v471_v7 = vadd.f32 %v3387_v33, %v470_v4  ;;  %v2676_v3 = vld [vmem:[%s3827_s3 + $0xa0] sm:$0xff] }
 0x197   :  { %v3217_v8 = vpop.eup %3216  ;;  %v1370_v57 = vld [vmem:[#allocation2 + $0x9] ss:$15 sm:$0xff]  ;;  %v1463_v4 = vld [vmem:[#allocation2 + $0xa] ss:$15 sm:$0xff] }
 0x198   :  { %530 = vst.msk [vmem:[#allocation2 + $0x82] sm:$0xff] %vm272_vm2, %v518_v5  ;;  %v517_v9 = vmul.f32 1.7159, %v3217_v8  ;;  %3222 = vtanh.f32 %v498_v6  ;;  %v497_v10 = vmul.f32 0.6666667, %v471_v7  ;;  %v2691_v8 = vld [vmem:[%s3827_s3 + $0xd0] sm:$0xff] }
 0x199   :  { %v543_v11 = vld [vmem:[#allocation2 + $0x1] ss:$15 sm:$0xff]  ;;  %v719_v41 = vld [vmem:[#allocation2 + $0x2] ss:$15 sm:$0xff]  ;;  %v2692_v5 = vld [vmem:[%s3827_s3 + $0xd8] sm:$0x3] }
 0x19a   :  { %v812_v12 = vld [vmem:[#allocation2 + $0x3] ss:$15 sm:$0xff]  ;;  %529 = vst.msk [vmem:[#allocation2 + $0x7a] sm:$0xff] %vm272_vm2, %v517_v9  ;;  %3224 = vtanh.f32 %v497_v10  ;;  %2945 = vmatprep.mubr.msk.f32.mxu0 %vm272_vm2, %v543_v11  ;;  %v905_v44 = vld [vmem:[#allocation2 + $0x4] ss:$15 sm:$0xff] }
 0x19b   :  { %2966 = vmatprep.mubr.msk.f32.mxu1 %vm272_vm2, %v812_v12  ;;  %v2940_v13 = vpop.f32.mrf.mxu1  ;;  %v998_v37 = vld [vmem:[#allocation2 + $0x5] ss:$15 sm:$0xff]  ;;  %v1091_v52 = vld [vmem:[#allocation2 + $0x6] ss:$15 sm:$0xff]  ;;  %v2687_v6 = vld [vmem:[%s3827_s3 + $0xc8] sm:$0x3] }
 0x19c   :  { %v486_v14 = vadd.f32 %v2940_v13, %v3387_v33  ;;  %v1184_v49 = vld [vmem:[#allocation2 + $0x7] ss:$15 sm:$0xff]  ;;  %v1277_v60 = vld [vmem:[#allocation2 + $0x8] ss:$15 sm:$0xff] }
 0x19d   :  { %v3219_v15 = vpop.eup %3218  ;;  %v480_v16 = vpop.f32.mrf.mxu1  ;;  %v1556_v1 = vld [vmem:[#allocation2 + $0xb] ss:$15 sm:$0xff]  ;;  %v1649_v12 = vld [vmem:[#allocation2 + $0xc] ss:$15 sm:$0xff] }
 0x19e   :  { %v520_v17 = vmul.f32 1.7159, %v3219_v15  ;;  %v500_v18 = vmul.f32 0.6666667, %v486_v14  ;;  %v481_v19 = vadd.f32 %v3387_v33, %v480_v16  ;;  %v540_v33 = vld [vmem:[%s3827_s3] sm:$0xff] }
 0x19f   :  { %v3221_v20 = vpop.eup %3220  ;;  %v1742_v9 = vld [vmem:[#allocation2 + $0xd] ss:$15 sm:$0xff] }
 0x1a0   :  { %532 = vst.msk [vmem:[#allocation2 + $0x92] sm:$0xff] %vm272_vm2, %v520_v17  ;;  %v519_v21 = vmul.f32 1.7159, %v3221_v20  ;;  %3226 = vtanh.f32 %v500_v18  ;;  %v499_v22 = vmul.f32 0.6666667, %v481_v19  ;;  %v2686_v11 = vld [vmem:[%s3827_s3 + $0xc0] sm:$0xff] }
 0x1a1   :  { %v2697_v13 = vld [vmem:[%s3827_s3 + $0xe8] sm:$0x3]  ;;  %v2696_v16 = vld [vmem:[%s3827_s3 + $0xe0] sm:$0xff]  ;;  %v3268_v19 = vmov 0.0   ;;  %v1958_v20 = vld [vmem:[%s3829_s5 + $0x30] sm:$0x3] }
 0x1a2   :  { %531 = vst.msk [vmem:[#allocation2 + $0x8a] sm:$0xff] %vm272_vm2, %v519_v21  ;;  %3228 = vtanh.f32 %v499_v22  ;;  %v1835_v17 = vld [vmem:[#allocation2 + $0xe] ss:$15 sm:$0xff] }
 0x1a3   :  { %v2711_v21 = vld [vmem:[%s3829_s5 + $0x68] sm:$0x3] }
 0x1a4   :  { %v1957_v22 = vld [vmem:[%s3829_s5 + $0x28] sm:$0xff] }
 0x1a5   :  { %v3223_v23 = vpop.eup %3222 }
 0x1a6   :  { %v522_v24 = vmul.f32 1.7159, %v3223_v23  ;;  %v2710_v23 = vld [vmem:[%s3829_s5 + $0x60] sm:$0xff] }
 0x1a7   :  { %v3225_v25 = vpop.eup %3224 }
 0x1a8   :  { %534 = vst.msk [vmem:[#allocation2 + $0xa2] sm:$0xff] %vm272_vm2, %v522_v24  ;;  %v521_v26 = vmul.f32 1.7159, %v3225_v25  ;;  %v1956_v24 = vld [vmem:[%s3829_s5 + $0x20] sm:$0xff]  ;;  %v2709_v25 = vld [vmem:[%s3829_s5 + $0x58] sm:$0xff] }
 0x1aa   :  { %533 = vst.msk [vmem:[#allocation2 + $0x9a] sm:$0xff] %vm272_vm2, %v521_v26  ;;  %v1955_v26 = vld [vmem:[%s3829_s5 + $0x18] sm:$0xff] }
 0x1ad   :  { %v3227_v27 = vpop.eup %3226 }
 0x1ae   :  { %v524_v28 = vmul.f32 1.7159, %v3227_v27  ;;  %v2708_v27 = vld [vmem:[%s3829_s5 + $0x50] sm:$0xff] }
 0x1af   :  { %v3229_v29 = vpop.eup %3228  ;;  %v545_v30 = vld [vmem:[#allocation2 + $0x79] ss:$15 sm:$0xf]  ;;  %v539_v39 = vld [vmem:[#allocation2 + $0x78] ss:$15 sm:$0xf] }
 0x1b0   :  { %v814_v34 = vld [vmem:[#allocation2 + $0x7b] ss:$15 sm:$0xf]  ;;  %536 = vst.msk [vmem:[#allocation2 + $0xb2] sm:$0x3] %vm284_vm3, %v524_v28  ;;  %2946 = vmatmul.mubr.msk.f32.vlgmr.msra.gmra.mxu0 %vm272_vm2, %v545_v30  ;;  %v1954_v28 = vld [vmem:[%s3829_s5 + $0x10] sm:$0xff] }
 0x1b1   :  { %v523_v35 = vmul.f32 1.7159, %v3229_v29  ;;  %2967 = vmatmul.mubr.msk.f32.vlgmr.msra.gmra.mxu1 %vm272_vm2, %v814_v34  ;;  %2949 = vmatpush3.msk.msra.mxu0 %vm555_vm1, %v3373_v31  ;;  %v2651_v31 = vld [vmem:[%s3827_s3 + $0x50] sm:$0xff]  ;;  %v907_v50 = vld [vmem:[#allocation2 + $0x7c] ss:$15 sm:$0xf] }
 0x1b2   :  { %2952 = vmatprep.mubr.msk.f32.mxu0 %vm272_vm2, %v537_v36  ;;  %2950 = vmatprep.subr.mxu0 %v540_v33  ;;  %v1953_v29 = vld [vmem:[%s3829_s5 + $0x8] sm:$0xff]  ;;  %v2706_v30 = vld [vmem:[%s3829_s5 + $0x40] sm:$0xff] }
 0x1b3   :  { %535 = vst.msk [vmem:[#allocation2 + $0xaa] sm:$0xff] %vm272_vm2, %v523_v35  ;;  %2980 = vmatprep.mubr.msk.f32.mxu1 %vm272_vm2, %v998_v37  ;;  %2951 = vmatpush3.msra.mxu0 %v540_v33  ;;  %v2707_v33 = vld [vmem:[%s3829_s5 + $0x48] sm:$0xff]  ;;  %v1952_v34 = vld [vmem:[%s3829_s5] sm:$0xff]  ;;  %v2705_v35 = vld [vmem:[%s3829_s5 + $0x38] sm:$0xff] }
 0x1b4   :  { %2977 = vmatpush3.msk.msra.mxu1 %vm555_vm1, %v3380_v32  ;;  %2955 = vmatprep.subr.msk.mxu0 %vm555_vm1, %v2637_v38  ;;  %v721_v32 = vld [vmem:[#allocation2 + $0x7a] ss:$15 sm:$0xf] }
 0x1b5   :  { %2953 = vmatmul.mubr.msk.f32.vlgmr.msra.gmra.mxu0 %vm272_vm2, %v539_v39  ;;  %2978 = vmatprep.subr.mxu1 %v2651_v31 }
 0x1b6   :  { %2956 = vmatpush3.msk.msra.mxu0 %vm555_vm1, %v2637_v38  ;;  %2959 = vmatprep.mubr.msk.f32.mxu0 %vm272_vm2, %v719_v41 }
 0x1b7   :  { %2957 = vmatprep.subr.mxu0 %v2636_v40  ;;  %2979 = vmatpush3.msra.mxu1 %v2651_v31  ;;  %v1744_v14 = vld [vmem:[#allocation2 + $0x85] ss:$15 sm:$0xf]  ;;  %v1837_v18 = vld [vmem:[#allocation2 + $0x86] ss:$15 sm:$0xf] }
 0x1b8   :  { %2958 = vmatpush3.msra.mxu0 %v2636_v40  ;;  %2990 = vmatprep.subr.msk.mxu1 %vm555_vm1, %v2662_v45 }
 0x1b9   :  { %2969 = vmatprep.subr.msk.mxu0 %vm555_vm1, %v2647_v42  ;;  %2960 = vmatmul.mubr.msk.f32.vlgmr.msra.gmra.mxu0 %vm272_vm2, %v721_v32 }
 0x1ba   :  { %2970 = vmatpush3.msk.msra.mxu0 %vm555_vm1, %v2647_v42  ;;  %2973 = vmatprep.mubr.msk.f32.mxu0 %vm272_vm2, %v905_v44  ;;  %v1000_v46 = vld [vmem:[#allocation2 + $0x7d] ss:$15 sm:$0xf]  ;;  %v1093_v58 = vld [vmem:[#allocation2 + $0x7e] ss:$15 sm:$0xf] }
 0x1bb   :  { %2971 = vmatprep.subr.mxu0 %v2646_v43  ;;  %2981 = vmatmul.mubr.msk.f32.vlgmr.msra.gmra.mxu1 %vm272_vm2, %v1000_v46  ;;  %v1186_v55 = vld [vmem:[#allocation2 + $0x7f] ss:$15 sm:$0xf]  ;;  %v1279_v2 = vld [vmem:[#allocation2 + $0x80] ss:$15 sm:$0xf] }
 0x1bc   :  { %2972 = vmatpush3.msra.mxu0 %v2646_v43  ;;  %2991 = vmatpush3.msk.msra.mxu1 %vm555_vm1, %v2662_v45  ;;  %v1372_v63 = vld [vmem:[#allocation2 + $0x81] ss:$15 sm:$0xf]  ;;  %v1465_v10 = vld [vmem:[#allocation2 + $0x82] ss:$15 sm:$0xf] }
 0x1bd   :  { %2983 = vmatprep.subr.msk.mxu0 %vm555_vm1, %v2657_v47  ;;  %2994 = vmatprep.mubr.msk.f32.mxu1 %vm272_vm2, %v1184_v49  ;;  %v1558_v7 = vld [vmem:[#allocation2 + $0x83] ss:$15 sm:$0xf]  ;;  %v1651_v15 = vld [vmem:[#allocation2 + $0x84] ss:$15 sm:$0xf] }
 0x1be   :  { %2974 = vmatmul.mubr.msk.f32.vlgmr.msra.gmra.mxu0 %vm272_vm2, %v907_v50  ;;  %2992 = vmatprep.subr.mxu1 %v2661_v48 }
 0x1bf   :  { %2984 = vmatpush3.msk.msra.mxu0 %vm555_vm1, %v2657_v47  ;;  %2987 = vmatprep.mubr.msk.f32.mxu0 %vm272_vm2, %v1091_v52 }
 0x1c0   :  { %2985 = vmatprep.subr.mxu0 %v2656_v51  ;;  %2993 = vmatpush3.msra.mxu1 %v2661_v48 }
 0x1c1   :  { %2986 = vmatpush3.msra.mxu0 %v2656_v51  ;;  %2995 = vmatmul.mubr.msk.f32.vlgmr.msra.gmra.mxu1 %vm272_vm2, %v1186_v55 }
 0x1c2   :  { %3004 = vmatprep.subr.msk.mxu1 %vm555_vm1, %v2672_v53  ;;  %2997 = vmatprep.subr.msk.mxu0 %vm555_vm1, %v2667_v54 }
 0x1c3   :  { %3005 = vmatpush3.msk.msra.mxu1 %vm555_vm1, %v2672_v53  ;;  %3008 = vmatprep.mubr.msk.f32.mxu1 %vm272_vm2, %v1370_v57 }
 0x1c4   :  { %2988 = vmatmul.mubr.msk.f32.vlgmr.msra.gmra.mxu0 %vm272_vm2, %v1093_v58  ;;  %3006 = vmatprep.subr.mxu1 %v2671_v56 }
 0x1c5   :  { %2998 = vmatpush3.msk.msra.mxu0 %vm555_vm1, %v2667_v54  ;;  %3001 = vmatprep.mubr.msk.f32.mxu0 %vm272_vm2, %v1277_v60 }
 0x1c6   :  { %2999 = vmatprep.subr.mxu0 %v2666_v59  ;;  %3007 = vmatpush3.msra.mxu1 %v2671_v56 }
 0x1c7   :  { %3000 = vmatpush3.msra.mxu0 %v2666_v59  ;;  %3009 = vmatmul.mubr.msk.f32.vlgmr.msra.gmra.mxu1 %vm272_vm2, %v1372_v63 }
 0x1c8   :  { %3018 = vmatprep.subr.msk.mxu1 %vm555_vm1, %v2682_v61  ;;  %3011 = vmatprep.subr.msk.mxu0 %vm555_vm1, %v2677_v62 }
 0x1c9   :  { %3019 = vmatpush3.msk.msra.mxu1 %vm555_vm1, %v2682_v61  ;;  %3022 = vmatprep.mubr.msk.f32.mxu1 %vm272_vm2, %v1556_v1 }
 0x1ca   :  { %3002 = vmatmul.mubr.msk.f32.vlgmr.msra.gmra.mxu0 %vm272_vm2, %v1279_v2  ;;  %3020 = vmatprep.subr.mxu1 %v2681_v0 }
 0x1cb   :  { %3012 = vmatpush3.msk.msra.mxu0 %vm555_vm1, %v2677_v62  ;;  %3015 = vmatprep.mubr.msk.f32.mxu0 %vm272_vm2, %v1463_v4 }
 0x1cc   :  { %3013 = vmatprep.subr.mxu0 %v2676_v3  ;;  %3021 = vmatpush3.msra.mxu1 %v2681_v0 }
 0x1cd   :  { %3014 = vmatpush3.msra.mxu0 %v2676_v3  ;;  %3023 = vmatmul.mubr.msk.f32.vlgmr.msra.gmra.mxu1 %vm272_vm2, %v1558_v7 }
 0x1ce   :  { %3032 = vmatprep.subr.msk.mxu1 %vm555_vm1, %v2692_v5  ;;  %3025 = vmatprep.subr.msk.mxu0 %vm555_vm1, %v2687_v6 }
 0x1cf   :  { %3033 = vmatpush3.msk.msra.mxu1 %vm555_vm1, %v2692_v5  ;;  %3036 = vmatprep.mubr.msk.f32.mxu1 %vm272_vm2, %v1742_v9 }
 0x1d0   :  { %3016 = vmatmul.mubr.msk.f32.vlgmr.msra.gmra.mxu0 %vm272_vm2, %v1465_v10  ;;  %3034 = vmatprep.subr.mxu1 %v2691_v8 }
 0x1d1   :  { %3026 = vmatpush3.msk.msra.mxu0 %vm555_vm1, %v2687_v6  ;;  %3029 = vmatprep.mubr.msk.f32.mxu0 %vm272_vm2, %v1649_v12 }
 0x1d2   :  { %3027 = vmatprep.subr.mxu0 %v2686_v11  ;;  %3035 = vmatpush3.msra.mxu1 %v2691_v8 }
 0x1d3   :  { %3028 = vmatpush3.msra.mxu0 %v2686_v11  ;;  %3037 = vmatmul.mubr.msk.f32.vlgmr.msra.gmra.mxu1 %vm272_vm2, %v1744_v14 }
 0x1d4   :  { %3039 = vmatprep.subr.msk.mxu0 %vm555_vm1, %v2697_v13  ;;  %3030 = vmatmul.mubr.msk.f32.vlgmr.msra.gmra.mxu0 %vm272_vm2, %v1651_v15 }
 0x1d5   :  { %3040 = vmatpush3.msk.msra.mxu0 %vm555_vm1, %v2697_v13  ;;  %3043 = vmatprep.mubr.msk.f32.mxu0 %vm272_vm2, %v1835_v17 }
 0x1d6   :  { %3041 = vmatprep.subr.mxu0 %v2696_v16  ;;  %3046 = vmatprep.subr.mxu1 %v3268_v19 }
 0x1d7   :  { %3042 = vmatpush3.msra.mxu0 %v2696_v16  ;;  %3047 = vmatpush3.msk.msra.mxu1 %vm555_vm1, %v1958_v20 }
 0x1d8   :  { %3044 = vmatmul.mubr.msk.f32.vlgmr.msra.gmra.mxu0 %vm272_vm2, %v1837_v18  ;;  %3063 = vmatprep.subr.mxu0 %v3268_v19 }
 0x1d9   :  { %3064 = vmatpush3.msk.msra.mxu0 %vm555_vm1, %v2711_v21  ;;  %3048 = vmatprep.subr.mxu1 %v3268_v19 }
 0x1da   :  { %3065 = vmatprep.subr.mxu0 %v3268_v19  ;;  %3049 = vmatpush3.msra.mxu1 %v1957_v22 }
 0x1db   :  { %3066 = vmatpush3.msra.mxu0 %v2710_v23  ;;  %3050 = vmatprep.subr.mxu1 %v3268_v19 }
 0x1dc   :  { %3067 = vmatprep.subr.mxu0 %v3268_v19  ;;  %3051 = vmatpush3.msra.mxu1 %v1956_v24 }
 0x1dd   :  { %3068 = vmatpush3.msra.mxu0 %v2709_v25  ;;  %3052 = vmatprep.subr.mxu1 %v3268_v19  ;;  %v2701_v25 = vld [vmem:[%s3828_s4] ss:$0 sm:$0xff] }
 0x1de   :  { %3069 = vmatprep.subr.mxu0 %v3268_v19  ;;  %3053 = vmatpush3.msra.mxu1 %v1955_v26 }
 0x1df   :  { %3070 = vmatpush3.msra.mxu0 %v2708_v27  ;;  %3054 = vmatprep.subr.mxu1 %v3268_v19 }
 0x1e0   :  { %3071 = vmatprep.subr.mxu0 %v3268_v19  ;;  %3055 = vmatpush3.msra.mxu1 %v1954_v28 }
 0x1e1   :  { %3072 = vmatpush3.msra.mxu0 %v2707_v33  ;;  %3056 = vmatprep.subr.mxu1 %v3268_v19 }
 0x1e2   :  { %3073 = vmatprep.subr.mxu0 %v3268_v19  ;;  %3057 = vmatpush3.msra.mxu1 %v1953_v29 }
 0x1e3   :  { %3074 = vmatpush3.msra.mxu0 %v2706_v30  ;;  %3058 = vmatprep.subr.mxu1 %v3268_v19 }
 0x1e4   :  { %3075 = vmatprep.subr.mxu0 %v3268_v19  ;;  %3059 = vmatpush3.msra.mxu1 %v1952_v34 }
 0x1e5   :  { %3076 = vmatpush3.msra.mxu0 %v2705_v35  ;;  %3060 = vmatprep.mubr.msk.f32.mxu1 %vm3269_vm4, %v3268_v19 }
 0x1e6   :  { %3077 = vmatprep.mubr.msk.f32.mxu0 %vm3269_vm4, %v3268_v19  ;;  %3080 = vmatprep.subr.mxu1 %v3268_v19 }
 0x1e7   :  { %3097 = vmatprep.subr.mxu0 %v3268_v19 }
 0x270   :  { %v2947_v36 = vpop.f32.mrf.mxu0 }
 0x271   :  { %v2968_v38 = vpop.f32.mrf.mxu1 }
 0x272   :  { %v625_v37 = vpop.f32.mrf.mxu0 }
 0x273   :  { %v893_v41 = vpop.f32.mrf.mxu1 }
 0x275   :  { %v2954_v39 = vpop.f32.mrf.mxu0 }
 0x276   :  { %v715_v31 = vadd.f32 %v2954_v39, %v2947_v36 }
 0x277   :  { %v709_v40 = vpop.f32.mrf.mxu0 }
 0x278   :  { %v710_v32 = vadd.f32 %v709_v40, %v625_v37 }
 0x279   :  { %v2961_v42 = vpop.f32.mrf.mxu0 }
 0x27a   :  { %v810_v43 = vadd.f32 %v2961_v42, %v715_v31 }
 0x27b   :  { %v800_v44 = vpop.f32.mrf.mxu0  ;;  %v2982_v45 = vpop.f32.mrf.mxu1 }
 0x27c   :  { %v809_v46 = vadd.f32 %v800_v44, %v710_v32  ;;  %v903_v47 = vadd.f32 %v2968_v38, %v810_v43  ;;  %v2720_v32 = vld [vmem:[%s3829_s5 + $0xa0] sm:$0x3]  ;;  %v2729_v43 = vld [vmem:[%s3829_s5 + $0xd8] sm:$0x3] }
 0x27d   :  { %v1079_v49 = vpop.f32.mrf.mxu1 }
 0x27e   :  { %v2975_v48 = vpop.f32.mrf.mxu0  ;;  %v902_v50 = vadd.f32 %v893_v41, %v809_v46  ;;  %v2719_v46 = vld [vmem:[%s3829_s5 + $0x98] sm:$0xff] }
 0x27f   :  { %v996_v51 = vadd.f32 %v2975_v48, %v903_v47  ;;  %v2728_v47 = vld [vmem:[%s3829_s5 + $0xd0] sm:$0xff] }
 0x280   :  { %v986_v52 = vpop.f32.mrf.mxu0  ;;  %v2718_v48 = vld [vmem:[%s3829_s5 + $0x90] sm:$0xff] }
 0x281   :  { %v995_v53 = vadd.f32 %v986_v52, %v902_v50  ;;  %v1089_v54 = vadd.f32 %v2982_v45, %v996_v51  ;;  %v2996_v55 = vpop.f32.mrf.mxu1  ;;  %v2717_v50 = vld [vmem:[%s3829_s5 + $0x88] sm:$0xff]  ;;  %v2726_v51 = vld [vmem:[%s3829_s5 + $0xc0] sm:$0xff] }
 0x282   :  { %v2716_v52 = vld [vmem:[%s3829_s5 + $0x80] sm:$0xff] }
 0x283   :  { %v1088_v56 = vadd.f32 %v1079_v49, %v995_v53  ;;  %v1265_v58 = vpop.f32.mrf.mxu1  ;;  %v2727_v49 = vld [vmem:[%s3829_s5 + $0xc8] sm:$0xff]  ;;  %v2725_v53 = vld [vmem:[%s3829_s5 + $0xb8] sm:$0xff] }
 0x284   :  { %v2989_v57 = vpop.f32.mrf.mxu0 }
 0x285   :  { %v1182_v59 = vadd.f32 %v2989_v57, %v1089_v54  ;;  %v2715_v54 = vld [vmem:[%s3829_s5 + $0x78] sm:$0xff]  ;;  %v2723_v57 = vld [vmem:[%s3829_s5 + $0xa8] sm:$0xff] }
 0x286   :  { %v1172_v60 = vpop.f32.mrf.mxu0 }
 0x287   :  { %v1181_v61 = vadd.f32 %v1172_v60, %v1088_v56  ;;  %v1275_v62 = vadd.f32 %v2996_v55, %v1182_v59  ;;  %v3010_v63 = vpop.f32.mrf.mxu1  ;;  %v2724_v55 = vld [vmem:[%s3829_s5 + $0xb0] sm:$0xff]  ;;  %v2747_v59 = vld [vmem:[%s3829_s5 + $0x148] sm:$0x3] }
 0x288   :  { %v2714_v56 = vld [vmem:[%s3829_s5 + $0x70] sm:$0xff] }
 0x289   :  { %v1274_v0 = vadd.f32 %v1265_v58, %v1181_v61  ;;  %v1451_v2 = vpop.f32.mrf.mxu1  ;;  %v2738_v58 = vld [vmem:[%s3829_s5 + $0x110] sm:$0x3] }
 0x28a   :  { %v3003_v1 = vpop.f32.mrf.mxu0 }
 0x28b   :  { %v1368_v3 = vadd.f32 %v3003_v1, %v1275_v62  ;;  %v2737_v62 = vld [vmem:[%s3829_s5 + $0x108] sm:$0xff]  ;;  %v2745_v1 = vld [vmem:[%s3829_s5 + $0x138] sm:$0xff] }
 0x28c   :  { %v1358_v4 = vpop.f32.mrf.mxu0 }
 0x28d   :  { %v1367_v5 = vadd.f32 %v1358_v4, %v1274_v0  ;;  %v1461_v6 = vadd.f32 %v3010_v63, %v1368_v3  ;;  %v3024_v7 = vpop.f32.mrf.mxu1  ;;  %v2746_v63 = vld [vmem:[%s3829_s5 + $0x140] sm:$0xff]  ;;  %v2744_v3 = vld [vmem:[%s3829_s5 + $0x130] sm:$0xff] }
 0x28e   :  { %v2736_v0 = vld [vmem:[%s3829_s5 + $0x100] sm:$0xff]  ;;  %v2734_v4 = vld [vmem:[%s3829_s5 + $0xf0] sm:$0xff] }
 0x28f   :  { %v1460_v8 = vadd.f32 %v1451_v2, %v1367_v5  ;;  %v1637_v11 = vpop.f32.mrf.mxu1  ;;  %v2735_v2 = vld [vmem:[%s3829_s5 + $0xf8] sm:$0xff]  ;;  %v2743_v5 = vld [vmem:[%s3829_s5 + $0x128] sm:$0xff] }
 0x290   :  { %v3017_v9 = vpop.f32.mrf.mxu0 }
 0x291   :  { %v1554_v10 = vadd.f32 %v3017_v9, %v1461_v6  ;;  %v2733_v6 = vld [vmem:[%s3829_s5 + $0xe8] sm:$0xff]  ;;  %v2741_v9 = vld [vmem:[%s3829_s5 + $0x118] sm:$0xff] }
 0x292   :  { %v1544_v12 = vpop.f32.mrf.mxu0 }
 0x293   :  { %v1553_v13 = vadd.f32 %v1544_v12, %v1460_v8  ;;  %v1647_v14 = vadd.f32 %v3024_v7, %v1554_v10  ;;  %v3038_v15 = vpop.f32.mrf.mxu1  ;;  %v2742_v7 = vld [vmem:[%s3829_s5 + $0x120] sm:$0xff] }
 0x294   :  { %v3031_v16 = vpop.f32.mrf.mxu0  ;;  %v2732_v8 = vld [vmem:[%s3829_s5 + $0xe0] sm:$0xff] }
 0x295   :  { %v1646_v17 = vadd.f32 %v1637_v11, %v1553_v13  ;;  %v1740_v18 = vadd.f32 %v3031_v16, %v1647_v14  ;;  %v1823_v23 = vpop.f32.mrf.mxu1  ;;  %v2494_v12 = vld [vmem:[%s3831_s7 + $0x60] sm:$0xf]  ;;  %v2493_v13 = vld [vmem:[%s3831_s7 + $0x58] sm:$0xff]  ;;  %v2492_v14 = vld [vmem:[%s3831_s7 + $0x50] sm:$0xff] }
 0x296   :  { %v1730_v20 = vpop.f32.mrf.mxu0  ;;  %v2490_v16 = vld [vmem:[%s3831_s7 + $0x40] sm:$0xff] }
 0x297   :  { %v1739_v21 = vadd.f32 %v1730_v20, %v1646_v17  ;;  %v1833_v22 = vadd.f32 %v3038_v15, %v1740_v18  ;;  %v2491_v15 = vld [vmem:[%s3831_s7 + $0x48] sm:$0xff]  ;;  %v2489_v17 = vld [vmem:[%s3831_s7 + $0x38] sm:$0xff]  ;;  %v2488_v18 = vld [vmem:[%s3831_s7 + $0x30] sm:$0xff] }
 0x298   :  { %v3045_v24 = vpop.f32.mrf.mxu0  ;;  %v2487_v20 = vld [vmem:[%s3831_s7 + $0x28] sm:$0xff] }
 0x299   :  { %v1926_v26 = vadd.f32 %v3045_v24, %v1833_v22  ;;  %v1832_v27 = vadd.f32 %v1823_v23, %v1739_v21  ;;  %v2486_v21 = vld [vmem:[%s3831_s7 + $0x20] sm:$0xff]  ;;  %v2485_v22 = vld [vmem:[%s3831_s7 + $0x18] sm:$0xff]  ;;  %v2484_v23 = vld [vmem:[%s3831_s7 + $0x10] sm:$0xff] }
 0x29a   :  { %v1916_v28 = vpop.f32.mrf.mxu0  ;;  %v2483_v24 = vld [vmem:[%s3831_s7 + $0x8] sm:$0xff] }
 0x29b   :  { %v1935_v33 = vadd.f32 %v2701_v25, %v1926_v26  ;;  %v1925_v29 = vadd.f32 %v1916_v28, %v1832_v27 }
 0x29d   :  { %v1937_v30 = vsub.f32 0.0, %v1935_v33  ;;  %v1934_v34 = vadd.f32 %v2701_v25, %v1925_v29  ;;  %v2482_v25 = vld [vmem:[%s3831_s7] sm:$0xff] }
 0x29f   :  { %v1940_v35 = vmul.f32 1.442695, %v1937_v30  ;;  %v1936_v36 = vsub.f32 0.0, %v1934_v34  ;;  %v2704_v34 = vld [vmem:[%s3830_s6] ss:$0 sm:$0xff] }
 0x2a1   :  { %3230 = vpow2.f32 %v1940_v35  ;;  %v1938_v37 = vmul.f32 1.442695, %v1936_v36 }
 0x2a3   :  { %3232 = vpow2.f32 %v1938_v37 }
 0x2ae   :  { %v3231_v38 = vpop.eup %3230 }
 0x2af   :  { %v1943_v39 = vadd.f32 1.0, %v3231_v38 }
 0x2b0   :  { %v3233_v40 = vpop.eup %3232 }
 0x2b1   :  { %3234 = vrcp.f32 %v1943_v39  ;;  %v1942_v31 = vadd.f32 1.0, %v3233_v40 }
 0x2b3   :  { %3236 = vrcp.f32 %v1942_v31 }
 0x2be   :  { %v3235_v41 = vpop.eup %3234 }
 0x2bf   :  { %1949 = vst.msk [vmem:[#allocation3 + $0x8] sm:$0xf] %vm1948_vm5, %v3235_v41 }
 0x2c0   :  { %v3237_v42 = vpop.eup %3236 }
 0x2c1   :  { %1947 = vst.msk [vmem:[#allocation3] sm:$0xff] %vm1946_vm6, %v3237_v42 }
 0x2c8   :  { %v1951_v44 = vld [vmem:[#allocation3] ss:$6 sm:$0x3]  ;;  %v2043_v45 = vld [vmem:[#allocation3 + $0x1] ss:$6 sm:$0x3] }
 0x2c9   :  { %3061 = vmatmul.mubr.msk.f32.vlgmr.msra.gmra.mxu1 %vm1946_vm6, %v1951_v44  ;;  %3078 = vmatmul.mubr.msk.f32.vlgmr.msra.gmra.mxu0 %vm1946_vm6, %v2043_v45  ;;  %v2130_v60 = vld [vmem:[#allocation3 + $0x2] ss:$6 sm:$0x3]  ;;  %v2217_v61 = vld [vmem:[#allocation3 + $0x3] ss:$6 sm:$0x3] }
 0x2ca   :  { %3081 = vmatpush3.msk.msra.mxu1 %vm555_vm1, %v2720_v32  ;;  %3098 = vmatpush3.msk.msra.mxu0 %vm555_vm1, %v2729_v43  ;;  %v2304_v10 = vld [vmem:[#allocation3 + $0x4] ss:$6 sm:$0x3]  ;;  %v2391_v11 = vld [vmem:[#allocation3 + $0x5] ss:$6 sm:$0x3] }
 0x2cb   :  { %3082 = vmatprep.subr.mxu1 %v3268_v19  ;;  %3099 = vmatprep.subr.mxu0 %v3268_v19 }
 0x2cc   :  { %3083 = vmatpush3.msra.mxu1 %v2719_v46  ;;  %3100 = vmatpush3.msra.mxu0 %v2728_v47 }
 0x2cd   :  { %3084 = vmatprep.subr.mxu1 %v3268_v19  ;;  %3101 = vmatprep.subr.mxu0 %v3268_v19 }
 0x2ce   :  { %3085 = vmatpush3.msra.mxu1 %v2718_v48  ;;  %3102 = vmatpush3.msra.mxu0 %v2727_v49  ;;  %v2750_v49 = vld [vmem:[%s3832_s8] ss:$0 sm:$0xff] }
 0x2cf   :  { %3086 = vmatprep.subr.mxu1 %v3268_v19  ;;  %3103 = vmatprep.subr.mxu0 %v3268_v19 }
 0x2d0   :  { %3087 = vmatpush3.msra.mxu1 %v2717_v50  ;;  %3104 = vmatpush3.msra.mxu0 %v2726_v51 }
 0x2d1   :  { %3088 = vmatprep.subr.mxu1 %v3268_v19  ;;  %3105 = vmatprep.subr.mxu0 %v3268_v19 }
 0x2d2   :  { %3089 = vmatpush3.msra.mxu1 %v2716_v52  ;;  %3106 = vmatpush3.msra.mxu0 %v2725_v53 }
 0x2d3   :  { %3090 = vmatprep.subr.mxu1 %v3268_v19  ;;  %3107 = vmatprep.subr.mxu0 %v3268_v19 }
 0x2d4   :  { %3091 = vmatpush3.msra.mxu1 %v2715_v54  ;;  %3108 = vmatpush3.msra.mxu0 %v2724_v55 }
 0x2d5   :  { %3092 = vmatprep.subr.mxu1 %v3268_v19  ;;  %3109 = vmatprep.subr.mxu0 %v3268_v19 }
 0x2d6   :  { %3093 = vmatpush3.msra.mxu1 %v2714_v56  ;;  %3094 = vmatprep.mubr.msk.f32.mxu1 %vm3269_vm4, %v3268_v19 }
 0x2d7   :  { %3110 = vmatpush3.msra.mxu0 %v2723_v57  ;;  %3111 = vmatprep.mubr.msk.f32.mxu0 %vm3269_vm4, %v3268_v19 }
 0x2d8   :  { %3095 = vmatmul.mubr.msk.f32.vlgmr.msra.gmra.mxu1 %vm1946_vm6, %v2130_v60  ;;  %3112 = vmatmul.mubr.msk.f32.vlgmr.msra.gmra.mxu0 %vm1946_vm6, %v2217_v61 }
 0x2d9   :  { %3114 = vmatprep.subr.mxu1 %v3268_v19  ;;  %3131 = vmatprep.subr.mxu0 %v3268_v19 }
 0x2da   :  { %3115 = vmatpush3.msk.msra.mxu1 %vm555_vm1, %v2738_v58  ;;  %3132 = vmatpush3.msk.msra.mxu0 %vm555_vm1, %v2747_v59 }
 0x2db   :  { %3116 = vmatprep.subr.mxu1 %v3268_v19  ;;  %3133 = vmatprep.subr.mxu0 %v3268_v19 }
 0x2dc   :  { %3117 = vmatpush3.msra.mxu1 %v2737_v62  ;;  %3134 = vmatpush3.msra.mxu0 %v2746_v63 }
 0x2dd   :  { %3118 = vmatprep.subr.mxu1 %v3268_v19  ;;  %3135 = vmatprep.subr.mxu0 %v3268_v19 }
 0x2de   :  { %3119 = vmatpush3.msra.mxu1 %v2736_v0  ;;  %3136 = vmatpush3.msra.mxu0 %v2745_v1 }
 0x2df   :  { %3120 = vmatprep.subr.mxu1 %v3268_v19  ;;  %3137 = vmatprep.subr.mxu0 %v3268_v19 }
 0x2e0   :  { %3121 = vmatpush3.msra.mxu1 %v2735_v2  ;;  %3138 = vmatpush3.msra.mxu0 %v2744_v3 }
 0x2e1   :  { %3122 = vmatprep.subr.mxu1 %v3268_v19  ;;  %3139 = vmatprep.subr.mxu0 %v3268_v19 }
 0x2e2   :  { %3123 = vmatpush3.msra.mxu1 %v2734_v4  ;;  %3140 = vmatpush3.msra.mxu0 %v2743_v5 }
 0x2e3   :  { %3124 = vmatprep.subr.mxu1 %v3268_v19  ;;  %3141 = vmatprep.subr.mxu0 %v3268_v19 }
 0x2e4   :  { %3125 = vmatpush3.msra.mxu1 %v2733_v6  ;;  %3142 = vmatpush3.msra.mxu0 %v2742_v7 }
 0x2e5   :  { %3126 = vmatprep.subr.mxu1 %v3268_v19  ;;  %3143 = vmatprep.subr.mxu0 %v3268_v19 }
 0x2e6   :  { %3127 = vmatpush3.msra.mxu1 %v2732_v8  ;;  %3128 = vmatprep.mubr.msk.f32.mxu1 %vm3269_vm4, %v3268_v19 }
 0x2e7   :  { %3144 = vmatpush3.msra.mxu0 %v2741_v9  ;;  %3145 = vmatprep.mubr.msk.f32.mxu0 %vm3269_vm4, %v3268_v19 }
 0x2e8   :  { %3129 = vmatmul.mubr.msk.f32.vlgmr.msra.gmra.mxu1 %vm1946_vm6, %v2304_v10  ;;  %3146 = vmatmul.mubr.msk.f32.vlgmr.msra.gmra.mxu0 %vm1946_vm6, %v2391_v11 }
 0x2e9   :  { %3148 = vmatprep.subr.mxu1 %v3268_v19  ;;  %3174 = vmatprep.mubr.msk.f32.mxu1 %vm3269_vm4, %v3268_v19 }
 0x2ea   :  { %3149 = vmatpush3.msk.msra.mxu1 %vm2506_vm7, %v2494_v12 }
 0x2eb   :  { %3150 = vmatprep.subr.mxu1 %v3268_v19 }
 0x2ec   :  { %3151 = vmatpush3.msra.mxu1 %v2493_v13 }
 0x2ed   :  { %3152 = vmatprep.subr.mxu1 %v3268_v19 }
 0x2ee   :  { %3153 = vmatpush3.msra.mxu1 %v2492_v14 }
 0x2ef   :  { %3154 = vmatprep.subr.mxu1 %v3268_v19 }
 0x2f0   :  { %3155 = vmatpush3.msra.mxu1 %v2491_v15 }
 0x2f1   :  { %3156 = vmatprep.subr.mxu1 %v3268_v19 }
 0x2f2   :  { %3157 = vmatpush3.msra.mxu1 %v2490_v16 }
 0x2f3   :  { %3158 = vmatprep.subr.mxu1 %v3268_v19 }
 0x2f4   :  { %3159 = vmatpush3.msra.mxu1 %v2489_v17 }
 0x2f5   :  { %3160 = vmatprep.subr.mxu1 %v3268_v19 }
 0x2f6   :  { %3161 = vmatpush3.msra.mxu1 %v2488_v18 }
 0x2f7   :  { %3162 = vmatprep.subr.mxu1 %v3268_v19 }
 0x2f8   :  { %3163 = vmatpush3.msra.mxu1 %v2487_v20 }
 0x2f9   :  { %3164 = vmatprep.subr.mxu1 %v3268_v19 }
 0x2fa   :  { %3165 = vmatpush3.msra.mxu1 %v2486_v21 }
 0x2fb   :  { %3166 = vmatprep.subr.mxu1 %v3268_v19 }
 0x2fc   :  { %3167 = vmatpush3.msra.mxu1 %v2485_v22 }
 0x2fd   :  { %3168 = vmatprep.subr.mxu1 %v3268_v19 }
 0x2fe   :  { %3169 = vmatpush3.msra.mxu1 %v2484_v23 }
 0x2ff   :  { %3170 = vmatprep.subr.mxu1 %v3268_v19 }
 0x300   :  { %3171 = vmatpush3.msra.mxu1 %v2483_v24 }
 0x301   :  { %3172 = vmatprep.subr.mxu1 %v3268_v19 }
 0x302   :  { %3173 = vmatpush3.msra.mxu1 %v2482_v25 }
 0x389   :  { %v2031_v26 = vpop.f32.mrf.mxu1  ;;  %v2124_v27 = vpop.f32.mrf.mxu0 }
 0x38a   :  { %v2041_v37 = vadd.f32 %v2704_v34, %v2031_v26 }
 0x38b   :  { %v3062_v28 = vpop.f32.mrf.mxu1  ;;  %v3079_v33 = vpop.f32.mrf.mxu0 }
 0x38c   :  { %v2128_v38 = vadd.f32 %v2124_v27, %v2041_v37 }
 0x398   :  { %v2211_v29 = vpop.f32.mrf.mxu1  ;;  %v2298_v30 = vpop.f32.mrf.mxu0 }
 0x399   :  { %v2215_v39 = vadd.f32 %v2211_v29, %v2128_v38 }
 0x39a   :  { %v3096_v35 = vpop.f32.mrf.mxu1  ;;  %v3113_v36 = vpop.f32.mrf.mxu0 }
 0x39b   :  { %v2302_v40 = vadd.f32 %v2298_v30, %v2215_v39 }
 0x3a8   :  { %v2385_v31 = vpop.f32.mrf.mxu1  ;;  %v2472_v41 = vpop.f32.mrf.mxu0 }
 0x3a9   :  { %v2389_v19 = vadd.f32 %v2385_v31, %v2302_v40 }
 0x3aa   :  { %v3130_v42 = vpop.f32.mrf.mxu1  ;;  %v3147_v32 = vpop.f32.mrf.mxu0 }
 0x3ab   :  { %v2476_v43 = vadd.f32 %v2472_v41, %v2389_v19 }
 0x3ad   :  { %v2477_v44 = vsub.f32 0.0, %v2476_v43 }
 0x3af   :  { %v2478_v45 = vmul.f32 1.442695, %v2477_v44 }
 0x3b1   :  { %3238 = vpow2.f32 %v2478_v45 }
 0x3be   :  { %v3239_v46 = vpop.eup %3238 }
 0x3bf   :  { %v2480_v47 = vadd.f32 1.0, %v3239_v46 }
 0x3c1   :  { %3240 = vrcp.f32 %v2480_v47 }
 0x3ce   :  { %v3241_v48 = vpop.eup %3240 }
 0x3cf   :  { %3175 = vmatmul.mubr.msk.f32.vlgmr.msra.gmra.mxu1 %vm2502_vm8, %v3241_v48 }
 0x48f   :  { %v2576_v50 = vpop.f32.mrf.mxu1 }
 0x490   :  { %v2577_v51 = vadd.f32 %v2750_v49, %v2576_v50 }
 0x491   :  { %v3176_v52 = vpop.f32.mrf.mxu1 }
 0x492   :  { %v2580_v53 = vsub.f32 0.0, %v2577_v51 }
 0x494   :  { %v2581_v54 = vmul.f32 1.442695, %v2580_v53 }
 0x496   :  { %3242 = vpow2.f32 %v2581_v54 }
 0x4a3   :  { %v3243_v55 = vpop.eup %3242 }
 0x4a4   :  { %v2583_v56 = vadd.f32 1.0, %v3243_v55 }
 0x4a6   :  { %3244 = vrcp.f32 %v2583_v56 }
 0x4b3   :  { %v3245_v57 = vpop.eup %3244 }
 0x4b4   :  { %2586 = vst.msk [vmem:[#allocation4] sm:$0x3] %vm2585_vm9, %v3245_v57 }
 0x4b5   :  { %3257 = shalt.err (!%p3254_p4)
}
 0x4b6   :  { %2596 = dma.vmem_to_hbm [thread:$0]  %s2594_s13, 32, %s3833_s9, [#allocation5]  }
 0x4b7   :  { %3266 = dma.done.wait [#allocation5], 32  }
 0x4b8   :  { %3267 = vsyncadd [#allocation5], 4294967264 }
 0x4b9   :  { %2600 = vsyncpa [#allocation5], 1 }

</bundles_post_ra>
